<compile_context>
chip_gen: v6e
topology: v6e:2x2x1
jax: 0.10.0
libtpu: 0.0.40
codegen_flags: <defaults>
</compile_context>

<pallas_src>
import functools
import math

import jax
import jax.numpy as jnp
from jax.experimental import pallas as pl
from jax.experimental.pallas import tpu as pltpu


# ----------------------------------------------------------------------------
# Fused Pallas kernel
# ----------------------------------------------------------------------------

def _fused_kernel(coefs_ref, x0_ref, noise_ref, tb_ref, params_ref, pred_ref, *, W, HW):
    """One grid step = one lane-packed row of `ipb` images (L = ipb*HW lanes)."""
    L = x0_ref.shape[-1]

    P = params_ref[...]                 # (hidden, 19): [conv1 taps | conv2 taps | b2]
    w1 = P[:, 0:9]                      # (hidden, 9)  conv1: 1 -> hidden
    w2 = P[:, 9:18]                     # (hidden, 9)  conv2: hidden -> 1
    b2 = P[0:1, 18:19]                  # (1, 1)

    # q-sample, lane-dense (1, L); coefficients arrive pre-broadcast per pixel.
    cf = coefs_ref[...]                 # (2, L)
    xt = cf[0:1, :] * x0_ref[...] + cf[1:2, :] * noise_ref[...]

    # Static 3x3 tap geometry + validity masks (also mask image boundaries
    # inside the packed row and the roll wrap-around at the block ends).
    lin = jax.lax.broadcasted_iota(jnp.int32, (1, L), 1)
    pos = lin % HW                      # flat position inside each packed image
    col = lin % W                       # column inside each image row

    taps = []
    for dy in (-1, 0, 1):
        for dx in (-1, 0, 1):
            s = dy * W + dx
            if s > 0:
                m = pos < (HW - s)
            elif s < 0:
                m = pos >= (-s)
            else:
                m = None
            if dx == -1:
                m = (col >= 1) if m is None else jnp.logical_and(m, col >= 1)
            elif dx == 1:
                m = (col <= W - 2) if m is None else jnp.logical_and(m, col <= W - 2)
            taps.append((s, m))

    def shifted(x, s, m):
        # out[..., p] = x[..., p + s] inside the image, 0 outside.
        # pltpu.roll == jnp.roll semantics; shift kept non-negative via modulo.
        r = x if s == 0 else pltpu.roll(x, (-s) % L, axis=1)
        return r if m is None else jnp.where(m, r, 0.0)

    # conv1: 9 VPU broadcast-MACs into a (hidden, L) accumulator, seeded with the
    # pre-combined bias (conv1 bias + time-embedding projection).
    h = tb_ref[...]
    for k, (s, m) in enumerate(taps):
        h = h + w1[:, k:k + 1] * shifted(xt, s, m)
    h = h * jax.nn.sigmoid(h)           # SiLU

    # conv2: per-tap broadcast-MACs (no materialized (9*hidden, L) operand),
    # one cross-sublane (XLU) reduction at the end.
    s0, m0 = taps[0]
    z = w2[:, 0:1] * shifted(h, s0, m0)
    for k in range(1, 9):
        s, m = taps[k]
        z = z + w2[:, k:k + 1] * shifted(h, s, m)

    pred_ref[...] = jnp.sum(z, axis=0, keepdims=True) + b2


def diffusion_forward_fused(coefs, x0_row, noise_row, tb_row, params, *,
                            W, HW, images_per_block):
    hidden = tb_row.shape[0]
    total = x0_row.shape[-1]            # B * HW
    L = images_per_block * HW
    n_blocks = total // L

    kernel = functools.partial(_fused_kernel, W=W, HW=HW)
    return pl.pallas_call(
        kernel,
        out_shape=jax.ShapeDtypeStruct((1, total), jnp.float32),
        grid_spec=pltpu.PrefetchScalarGridSpec(
            num_scalar_prefetch=0,
            grid=(n_blocks,),
            in_specs=[
                pl.BlockSpec((2, L), lambda i: (0, i)),                    # coefs
                pl.BlockSpec((1, L), lambda i: (0, i)),                    # x0
                pl.BlockSpec((1, L), lambda i: (0, i)),                    # noise
                pl.BlockSpec((hidden, L), lambda i: (0, i)),               # time bias row
                pl.BlockSpec((hidden, params.shape[1]), lambda i: (0, 0)),  # packed params
            ],
            out_specs=pl.BlockSpec((1, L), lambda i: (0, i)),
        ),
        compiler_params=pltpu.CompilerParams(
            dimension_semantics=("parallel",)),     # v7x: grid steps split across TCs
    )(coefs, x0_row, noise_row, tb_row, params)


# ----------------------------------------------------------------------------
# Model (parameter setup + tiny glue in JAX, hot path in one fused Pallas kernel)
# ----------------------------------------------------------------------------

def sinusoidal_embedding(t, dim):
    half = dim // 2
    freqs = jnp.exp(-math.log(10000.0) * jnp.arange(half, dtype=jnp.float32) / (half - 1))
    args = t.astype(jnp.float32)[:, None] * freqs[None, :]
    return jnp.concatenate([jnp.sin(args), jnp.cos(args)], axis=-1)


def _single_tensorcore_chip():
    """True on 1-TC chips (v5e / v6e): run the whole batch as one grid step there.
    On 2-TC chips (v7x, megacore) grid=(B,) + "parallel" keeps both cores busy."""
    try:
        kind = jax.devices()[0].device_kind.lower()
    except Exception:  # pragma: no cover
        return False
    return any(tag in kind for tag in ("v5 lite", "v5e", "v5lite", "v6 lite", "v6e"))


class DiffusionModelPallas:
    def __init__(self, key, n_train_steps=1000, img_dims=(1, 16, 16),
                 hidden=16, emb_dim=32):
        self.n_train_steps = n_train_steps
        self.img_dims = tuple(img_dims)
        self.emb_dim = emb_dim
        self.hidden = hidden
        c_in, H, W = img_dims
        self.HW = c_in * H * W
        # TODO(synk): fused lane-shift conv path assumes single-channel images.
        assert c_in == 1, "fused kernel currently supports c_in == 1"

        # DDPM sampler tables (linear beta schedule)
        betas = jnp.linspace(1e-4, 0.02, n_train_steps, dtype=jnp.float32)
        alphas_bar = jnp.cumprod(1.0 - betas)
        self.sqrt_ab = jnp.sqrt(alphas_bar)
        self.sqrt_1mab = jnp.sqrt(1.0 - alphas_bar)

        # Deterministic denoise-net parameters
        ks = jax.random.split(key, 5)

        def init(k, shape, fan_in):
            return (jax.random.normal(k, shape, jnp.float32) / math.sqrt(fan_in)).astype(jnp.float32)

        self.w_t1 = init(ks[0], (emb_dim, emb_dim), emb_dim)
        self.b_t1 = jnp.zeros((emb_dim,), jnp.float32)
        self.w_t2 = init(ks[1], (emb_dim, emb_dim), emb_dim)
        self.b_t2 = jnp.zeros((emb_dim,), jnp.float32)
        self.w_tp = init(ks[2], (emb_dim, hidden), emb_dim)
        self.b_tp = jnp.zeros((hidden,), jnp.float32)
        self.w_c1 = init(ks[3], (3, 3, c_in, hidden), 9 * c_in)
        self.b_c1 = jnp.zeros((hidden,), jnp.float32)
        self.w_c2 = init(ks[4], (3, 3, hidden, c_in), 9 * hidden)
        self.b_c2 = jnp.zeros((c_in,), jnp.float32)

        # One packed parameter buffer for the kernel: [conv1 taps | conv2 taps | b2]
        # -> a single small VMEM DMA instead of many tiny descriptors.
        w1_mat = self.w_c1.reshape(9, hidden).T                          # (hidden, 9)
        w2_mat = self.w_c2.reshape(9, hidden).T                          # (hidden, 9)
        b2_col = jnp.zeros((hidden, 1), jnp.float32).at[0, 0].set(self.b_c2[0])
        self.params = jnp.concatenate([w1_mat, w2_mat, b2_col], axis=1)  # (hidden, 19)

        self._single_tc = _single_tensorcore_chip()
        self._jit_forward = jax.jit(self._forward_impl)

    def _images_per_block(self, batch):
        # Lane blocks must be 128-aligned unless they span the full packed row.
        if self._single_tc or (self.HW % 128 != 0):
            return batch
        return 1

    def _forward_impl(self, x0_nchw, sample_steps, noise_nchw):
        B, C, H, W = x0_nchw.shape
        HW = C * H * W
        hi = jax.lax.Precision.HIGHEST

        # q-sample coefficients, broadcast to per-pixel lanes (supports several
        # images packed into one lane row).
        coef_a = self.sqrt_ab[sample_steps].astype(jnp.float32)          # (B,)
        coef_b = self.sqrt_1mab[sample_steps].astype(jnp.float32)        # (B,)
        coefs = jnp.broadcast_to(
            jnp.stack([coef_a, coef_b], axis=0)[:, :, None], (2, B, HW)
        ).reshape(2, B * HW)

        # Time-embedding MLP hoisted out of the kernel (depends only on t);
        # XLA overlaps this tiny op with the kernel's input DMAs.
        t = (sample_steps - 1).astype(jnp.float32)
        temb = sinusoidal_embedding(t, self.emb_dim)
        t1 = jnp.dot(temb, self.w_t1, precision=hi) + self.b_t1
        t1 = jax.nn.silu(t1)
        t2 = jnp.dot(t1, self.w_t2, precision=hi) + self.b_t2
        tproj = jnp.dot(t2, self.w_tp, precision=hi) + self.b_tp         # (B, hidden)
        tb = tproj + self.b_c1                                           # fold conv1 bias
        tb_row = jnp.broadcast_to(
            tb.T[:, :, None], (self.hidden, B, HW)).reshape(self.hidden, B * HW)

        # NCHW -> one lane-dense row (free reshape, C == 1).
        x0_row = x0_nchw.reshape(1, B * HW).astype(jnp.float32)
        noise_row = noise_nchw.reshape(1, B * HW).astype(jnp.float32)

        pred_row = diffusion_forward_fused(
            coefs, x0_row, noise_row, tb_row, self.params,
            W=W, HW=HW, images_per_block=self._images_per_block(B))
        return pred_row.reshape(B, C, H, W), noise_nchw

    def forward(self, x0, sample_steps, noise):
        assert tuple(x0.shape[1:]) == self.img_dims, "shape of image does not match img_dims"
        assert sample_steps.shape[0] == x0.shape[0], "batch_size not match"
        assert noise.shape == x0.shape, "shape not match"
        return self._jit_forward(x0, sample_steps, noise)


# ----------------------------------------------------------------------------
# Pure-JAX reference (for sanity check only)
# ----------------------------------------------------------------------------

def reference_forward(model, x0, sample_steps, noise):
    B, C, H, W = x0.shape
    hi = jax.lax.Precision.HIGHEST
    a = model.sqrt_ab[sample_steps].reshape(B, 1, 1, 1)
    b = model.sqrt_1mab[sample_steps].reshape(B, 1, 1, 1)
    xt = a * x0 + b * noise
    t = (sample_steps - 1).astype(jnp.float32)
    temb = sinusoidal_embedding(t, model.emb_dim)
    temb = jax.nn.silu(jnp.dot(temb, model.w_t1, precision=hi) + model.b_t1)
    temb = jnp.dot(temb, model.w_t2, precision=hi) + model.b_t2
    tproj = jnp.dot(temb, model.w_tp, precision=hi) + model.b_tp         # (B, hidden)
    xt_nhwc = xt.transpose(0, 2, 3, 1)
    h = jax.lax.conv_general_dilated(xt_nhwc, model.w_c1, (1, 1), "SAME",
                                     dimension_numbers=("NHWC", "HWIO", "NHWC"),
                                     precision=hi)
    h = jax.nn.silu(h + model.b_c1 + tproj[:, None, None, :])
    p = jax.lax.conv_general_dilated(h, model.w_c2, (1, 1), "SAME",
                                     dimension_numbers=("NHWC", "HWIO", "NHWC"),
                                     precision=hi)
    p = p + model.b_c2
    return p.transpose(0, 3, 1, 2), noise


# ----------------------------------------------------------------------------
# Main
# ----------------------------------------------------------------------------

if __name__ == "__main__":
    key = jax.random.PRNGKey(0)
    k_x0, k_t, k_noise, k_params = jax.random.split(key, 4)

    B, C, H, W = 2, 1, 16, 16
    n_train_steps = 1000

    x0 = jax.random.normal(k_x0, (B, C, H, W), jnp.float32)
    # sample_steps >= 1 so the (sample_steps - 1) time conditioning stays non-negative
    sample_steps = jax.random.randint(k_t, (B,), 1, n_train_steps)
    noise = jax.random.normal(k_noise, (B, C, H, W), jnp.float32)

    model = DiffusionModelPallas(k_params, n_train_steps=n_train_steps,
                                 img_dims=(C, H, W), hidden=16, emb_dim=32)

    pred_noise, noise_out = model.forward(x0, sample_steps, noise)
    jax.block_until_ready((pred_noise, noise_out))

    assert pred_noise.shape == (B, C, H, W)
    assert noise_out.shape == (B, C, H, W)

    # sanity check against a plain-JAX / XLA reference
    ref_pred, _ = reference_forward(model, x0, sample_steps, noise)
    err = float(jnp.max(jnp.abs(pred_noise - ref_pred)))
    assert err < 1e-2, f"kernel/reference mismatch: max abs err {err}"

    print("KERNEL_OK")
</pallas_src>

<mosaic_0001>
module attributes {stable_mosaic.version = 11 : i64} {
  func.func @_fused_kernel(%arg0: i32, %arg1: memref<2x256xf32, #tpu.memory_space<vmem>>, %arg2: memref<1x256xf32, #tpu.memory_space<vmem>>, %arg3: memref<1x256xf32, #tpu.memory_space<vmem>>, %arg4: memref<16x256xf32, #tpu.memory_space<vmem>>, %arg5: memref<16x19xf32, #tpu.memory_space<vmem>>, %arg6: memref<1x256xf32, #tpu.memory_space<vmem>>) attributes {dimension_semantics = [#tpu.dimension_semantics<parallel>], iteration_bounds = array<i64: 2>, scalar_prefetch = 0 : i64, scratch_operands = 0 : i64, tpu.core_type = #tpu.core_type<tc>, window_params = [{transform_indices = @transform_0, window_bounds = array<i64: 2, 256>}, {transform_indices = @transform_1, window_bounds = array<i64: 1, 256>}, {transform_indices = @transform_2, window_bounds = array<i64: 1, 256>}, {transform_indices = @transform_3, window_bounds = array<i64: 16, 256>}, {pipeline_mode = #tpu.pipeline_mode<synchronous>, transform_indices = @transform_4, window_bounds = array<i64: 16, 19>}, {transform_indices = @transform_5, window_bounds = array<i64: 1, 256>}]} {
    %c0 = arith.constant 0 : index
    %c0_0 = arith.constant 0 : index
    %0 = vector.load %arg5[%c0, %c0_0] : memref<16x19xf32, #tpu.memory_space<vmem>>, vector<16x19xf32>
    %1 = vector.extract_strided_slice %0 {offsets = [0, 0], sizes = [16, 9], strides = [1, 1]} : vector<16x19xf32> to vector<16x9xf32>
    %2 = vector.extract_strided_slice %0 {offsets = [0, 9], sizes = [16, 9], strides = [1, 1]} : vector<16x19xf32> to vector<16x9xf32>
    %3 = vector.extract_strided_slice %0 {offsets = [0, 18], sizes = [1, 1], strides = [1, 1]} : vector<16x19xf32> to vector<1x1xf32>
    %c0_1 = arith.constant 0 : index
    %c0_2 = arith.constant 0 : index
    %4 = vector.load %arg1[%c0_1, %c0_2] : memref<2x256xf32, #tpu.memory_space<vmem>>, vector<2x256xf32>
    %5 = vector.extract_strided_slice %4 {offsets = [0, 0], sizes = [1, 256], strides = [1, 1]} : vector<2x256xf32> to vector<1x256xf32>
    %c0_3 = arith.constant 0 : index
    %c0_4 = arith.constant 0 : index
    %6 = vector.load %arg2[%c0_3, %c0_4] : memref<1x256xf32, #tpu.memory_space<vmem>>, vector<1x256xf32>
    %7 = arith.mulf %5, %6 : vector<1x256xf32>
    %8 = vector.extract_strided_slice %4 {offsets = [1, 0], sizes = [1, 256], strides = [1, 1]} : vector<2x256xf32> to vector<1x256xf32>
    %c0_5 = arith.constant 0 : index
    %c0_6 = arith.constant 0 : index
    %9 = vector.load %arg3[%c0_5, %c0_6] : memref<1x256xf32, #tpu.memory_space<vmem>>, vector<1x256xf32>
    %10 = arith.mulf %8, %9 : vector<1x256xf32>
    %11 = arith.addf %7, %10 : vector<1x256xf32>
    %12 = tpu.iota {dimensions = array<i32: 1>} : vector<1x256xi32>
    %c256_i32 = arith.constant 256 : i32
    %c0_i32 = arith.constant 0 : i32
    %13 = arith.cmpi eq, %c256_i32, %c0_i32 : i32
    %c1_i32 = arith.constant 1 : i32
    %14 = arith.select %13, %c1_i32, %c256_i32 : i32
    %15 = vector.broadcast %14 : i32 to vector<1x256xi32>
    %16 = arith.remsi %12, %15 : vector<1x256xi32>
    %c0_i32_7 = arith.constant 0 : i32
    %17 = vector.broadcast %c0_i32_7 : i32 to vector<1x256xi32>
    %18 = arith.cmpi ne, %16, %17 : vector<1x256xi32>
    %c0_i32_8 = arith.constant 0 : i32
    %19 = vector.broadcast %c0_i32_8 : i32 to vector<1x256xi32>
    %20 = arith.cmpi slt, %16, %19 : vector<1x256xi32>
    %c0_i32_9 = arith.constant 0 : i32
    %21 = arith.cmpi slt, %14, %c0_i32_9 : i32
    %22 = vector.broadcast %21 : i1 to vector<1x256xi1>
    %23 = vector.broadcast %22 : vector<1x256xi1> to vector<1x256xi1>
    %24 = arith.xori %20, %23 : vector<1x256xi1>
    %25 = arith.andi %24, %18 : vector<1x256xi1>
    %26 = vector.broadcast %14 : i32 to vector<1x256xi32>
    %27 = arith.addi %16, %26 : vector<1x256xi32>
    %28 = arith.select %25, %27, %16 : vector<1x256xi1>, vector<1x256xi32>
    %c16_i32 = arith.constant 16 : i32
    %c0_i32_10 = arith.constant 0 : i32
    %29 = arith.cmpi eq, %c16_i32, %c0_i32_10 : i32
    %c1_i32_11 = arith.constant 1 : i32
    %30 = arith.select %29, %c1_i32_11, %c16_i32 : i32
    %31 = vector.broadcast %30 : i32 to vector<1x256xi32>
    %32 = arith.remsi %12, %31 : vector<1x256xi32>
    %c0_i32_12 = arith.constant 0 : i32
    %33 = vector.broadcast %c0_i32_12 : i32 to vector<1x256xi32>
    %34 = arith.cmpi ne, %32, %33 : vector<1x256xi32>
    %c0_i32_13 = arith.constant 0 : i32
    %35 = vector.broadcast %c0_i32_13 : i32 to vector<1x256xi32>
    %36 = arith.cmpi slt, %32, %35 : vector<1x256xi32>
    %c0_i32_14 = arith.constant 0 : i32
    %37 = arith.cmpi slt, %30, %c0_i32_14 : i32
    %38 = vector.broadcast %37 : i1 to vector<1x256xi1>
    %39 = vector.broadcast %38 : vector<1x256xi1> to vector<1x256xi1>
    %40 = arith.xori %36, %39 : vector<1x256xi1>
    %41 = arith.andi %40, %34 : vector<1x256xi1>
    %42 = vector.broadcast %30 : i32 to vector<1x256xi32>
    %43 = arith.addi %32, %42 : vector<1x256xi32>
    %44 = arith.select %41, %43, %32 : vector<1x256xi1>, vector<1x256xi32>
    %c17_i32 = arith.constant 17 : i32
    %45 = vector.broadcast %c17_i32 : i32 to vector<1x256xi32>
    %46 = arith.cmpi sge, %28, %45 : vector<1x256xi32>
    %c1_i32_15 = arith.constant 1 : i32
    %47 = vector.broadcast %c1_i32_15 : i32 to vector<1x256xi32>
    %48 = arith.cmpi sge, %44, %47 : vector<1x256xi32>
    %49 = arith.andi %46, %48 : vector<1x256xi1>
    %c16_i32_16 = arith.constant 16 : i32
    %50 = vector.broadcast %c16_i32_16 : i32 to vector<1x256xi32>
    %51 = arith.cmpi sge, %28, %50 : vector<1x256xi32>
    %c15_i32 = arith.constant 15 : i32
    %52 = vector.broadcast %c15_i32 : i32 to vector<1x256xi32>
    %53 = arith.cmpi sge, %28, %52 : vector<1x256xi32>
    %c14_i32 = arith.constant 14 : i32
    %54 = vector.broadcast %c14_i32 : i32 to vector<1x256xi32>
    %55 = arith.cmpi sle, %44, %54 : vector<1x256xi32>
    %56 = arith.andi %53, %55 : vector<1x256xi1>
    %c1_i32_17 = arith.constant 1 : i32
    %57 = vector.broadcast %c1_i32_17 : i32 to vector<1x256xi32>
    %58 = arith.cmpi sge, %28, %57 : vector<1x256xi32>
    %c1_i32_18 = arith.constant 1 : i32
    %59 = vector.broadcast %c1_i32_18 : i32 to vector<1x256xi32>
    %60 = arith.cmpi sge, %44, %59 : vector<1x256xi32>
    %61 = arith.andi %58, %60 : vector<1x256xi1>
    %c255_i32 = arith.constant 255 : i32
    %62 = vector.broadcast %c255_i32 : i32 to vector<1x256xi32>
    %63 = arith.cmpi slt, %28, %62 : vector<1x256xi32>
    %c14_i32_19 = arith.constant 14 : i32
    %64 = vector.broadcast %c14_i32_19 : i32 to vector<1x256xi32>
    %65 = arith.cmpi sle, %44, %64 : vector<1x256xi32>
    %66 = arith.andi %63, %65 : vector<1x256xi1>
    %c241_i32 = arith.constant 241 : i32
    %67 = vector.broadcast %c241_i32 : i32 to vector<1x256xi32>
    %68 = arith.cmpi slt, %28, %67 : vector<1x256xi32>
    %c1_i32_20 = arith.constant 1 : i32
    %69 = vector.broadcast %c1_i32_20 : i32 to vector<1x256xi32>
    %70 = arith.cmpi sge, %44, %69 : vector<1x256xi32>
    %71 = arith.andi %68, %70 : vector<1x256xi1>
    %c240_i32 = arith.constant 240 : i32
    %72 = vector.broadcast %c240_i32 : i32 to vector<1x256xi32>
    %73 = arith.cmpi slt, %28, %72 : vector<1x256xi32>
    %c239_i32 = arith.constant 239 : i32
    %74 = vector.broadcast %c239_i32 : i32 to vector<1x256xi32>
    %75 = arith.cmpi slt, %28, %74 : vector<1x256xi32>
    %c14_i32_21 = arith.constant 14 : i32
    %76 = vector.broadcast %c14_i32_21 : i32 to vector<1x256xi32>
    %77 = arith.cmpi sle, %44, %76 : vector<1x256xi32>
    %78 = arith.andi %75, %77 : vector<1x256xi1>
    %c0_22 = arith.constant 0 : index
    %c0_23 = arith.constant 0 : index
    %79 = vector.load %arg4[%c0_22, %c0_23] : memref<16x256xf32, #tpu.memory_space<vmem>>, vector<16x256xf32>
    %80 = vector.extract_strided_slice %1 {offsets = [0, 0], sizes = [16, 1], strides = [1, 1]} : vector<16x9xf32> to vector<16x1xf32>
    %c17_i32_24 = arith.constant 17 : i32
    %81 = tpu.dynamic_rotate %11 by %c17_i32_24 dim 1 : vector<1x256xf32>, i32 -> vector<1x256xf32>
    %cst = arith.constant 0.000000e+00 : f32
    %82 = vector.broadcast %cst : f32 to vector<1x256xf32>
    %83 = arith.select %49, %81, %82 : vector<1x256xi1>, vector<1x256xf32>
    %84 = vector.broadcast %80 : vector<16x1xf32> to vector<16x256xf32>
    %85 = vector.broadcast %83 : vector<1x256xf32> to vector<16x256xf32>
    %86 = arith.mulf %84, %85 : vector<16x256xf32>
    %87 = arith.addf %79, %86 : vector<16x256xf32>
    %88 = vector.extract_strided_slice %1 {offsets = [0, 1], sizes = [16, 1], strides = [1, 1]} : vector<16x9xf32> to vector<16x1xf32>
    %c16_i32_25 = arith.constant 16 : i32
    %89 = tpu.dynamic_rotate %11 by %c16_i32_25 dim 1 : vector<1x256xf32>, i32 -> vector<1x256xf32>
    %cst_26 = arith.constant 0.000000e+00 : f32
    %90 = vector.broadcast %cst_26 : f32 to vector<1x256xf32>
    %91 = arith.select %51, %89, %90 : vector<1x256xi1>, vector<1x256xf32>
    %92 = vector.broadcast %88 : vector<16x1xf32> to vector<16x256xf32>
    %93 = vector.broadcast %91 : vector<1x256xf32> to vector<16x256xf32>
    %94 = arith.mulf %92, %93 : vector<16x256xf32>
    %95 = arith.addf %87, %94 : vector<16x256xf32>
    %96 = vector.extract_strided_slice %1 {offsets = [0, 2], sizes = [16, 1], strides = [1, 1]} : vector<16x9xf32> to vector<16x1xf32>
    %c15_i32_27 = arith.constant 15 : i32
    %97 = tpu.dynamic_rotate %11 by %c15_i32_27 dim 1 : vector<1x256xf32>, i32 -> vector<1x256xf32>
    %cst_28 = arith.constant 0.000000e+00 : f32
    %98 = vector.broadcast %cst_28 : f32 to vector<1x256xf32>
    %99 = arith.select %56, %97, %98 : vector<1x256xi1>, vector<1x256xf32>
    %100 = vector.broadcast %96 : vector<16x1xf32> to vector<16x256xf32>
    %101 = vector.broadcast %99 : vector<1x256xf32> to vector<16x256xf32>
    %102 = arith.mulf %100, %101 : vector<16x256xf32>
    %103 = arith.addf %95, %102 : vector<16x256xf32>
    %104 = vector.extract_strided_slice %1 {offsets = [0, 3], sizes = [16, 1], strides = [1, 1]} : vector<16x9xf32> to vector<16x1xf32>
    %c1_i32_29 = arith.constant 1 : i32
    %105 = tpu.dynamic_rotate %11 by %c1_i32_29 dim 1 : vector<1x256xf32>, i32 -> vector<1x256xf32>
    %cst_30 = arith.constant 0.000000e+00 : f32
    %106 = vector.broadcast %cst_30 : f32 to vector<1x256xf32>
    %107 = arith.select %61, %105, %106 : vector<1x256xi1>, vector<1x256xf32>
    %108 = vector.broadcast %104 : vector<16x1xf32> to vector<16x256xf32>
    %109 = vector.broadcast %107 : vector<1x256xf32> to vector<16x256xf32>
    %110 = arith.mulf %108, %109 : vector<16x256xf32>
    %111 = arith.addf %103, %110 : vector<16x256xf32>
    %112 = vector.extract_strided_slice %1 {offsets = [0, 4], sizes = [16, 1], strides = [1, 1]} : vector<16x9xf32> to vector<16x1xf32>
    %113 = vector.broadcast %112 : vector<16x1xf32> to vector<16x256xf32>
    %114 = vector.broadcast %11 : vector<1x256xf32> to vector<16x256xf32>
    %115 = arith.mulf %113, %114 : vector<16x256xf32>
    %116 = arith.addf %111, %115 : vector<16x256xf32>
    %117 = vector.extract_strided_slice %1 {offsets = [0, 5], sizes = [16, 1], strides = [1, 1]} : vector<16x9xf32> to vector<16x1xf32>
    %c255_i32_31 = arith.constant 255 : i32
    %118 = tpu.dynamic_rotate %11 by %c255_i32_31 dim 1 : vector<1x256xf32>, i32 -> vector<1x256xf32>
    %cst_32 = arith.constant 0.000000e+00 : f32
    %119 = vector.broadcast %cst_32 : f32 to vector<1x256xf32>
    %120 = arith.select %66, %118, %119 : vector<1x256xi1>, vector<1x256xf32>
    %121 = vector.broadcast %117 : vector<16x1xf32> to vector<16x256xf32>
    %122 = vector.broadcast %120 : vector<1x256xf32> to vector<16x256xf32>
    %123 = arith.mulf %121, %122 : vector<16x256xf32>
    %124 = arith.addf %116, %123 : vector<16x256xf32>
    %125 = vector.extract_strided_slice %1 {offsets = [0, 6], sizes = [16, 1], strides = [1, 1]} : vector<16x9xf32> to vector<16x1xf32>
    %c241_i32_33 = arith.constant 241 : i32
    %126 = tpu.dynamic_rotate %11 by %c241_i32_33 dim 1 : vector<1x256xf32>, i32 -> vector<1x256xf32>
    %cst_34 = arith.constant 0.000000e+00 : f32
    %127 = vector.broadcast %cst_34 : f32 to vector<1x256xf32>
    %128 = arith.select %71, %126, %127 : vector<1x256xi1>, vector<1x256xf32>
    %129 = vector.broadcast %125 : vector<16x1xf32> to vector<16x256xf32>
    %130 = vector.broadcast %128 : vector<1x256xf32> to vector<16x256xf32>
    %131 = arith.mulf %129, %130 : vector<16x256xf32>
    %132 = arith.addf %124, %131 : vector<16x256xf32>
    %133 = vector.extract_strided_slice %1 {offsets = [0, 7], sizes = [16, 1], strides = [1, 1]} : vector<16x9xf32> to vector<16x1xf32>
    %c240_i32_35 = arith.constant 240 : i32
    %134 = tpu.dynamic_rotate %11 by %c240_i32_35 dim 1 : vector<1x256xf32>, i32 -> vector<1x256xf32>
    %cst_36 = arith.constant 0.000000e+00 : f32
    %135 = vector.broadcast %cst_36 : f32 to vector<1x256xf32>
    %136 = arith.select %73, %134, %135 : vector<1x256xi1>, vector<1x256xf32>
    %137 = vector.broadcast %133 : vector<16x1xf32> to vector<16x256xf32>
    %138 = vector.broadcast %136 : vector<1x256xf32> to vector<16x256xf32>
    %139 = arith.mulf %137, %138 : vector<16x256xf32>
    %140 = arith.addf %132, %139 : vector<16x256xf32>
    %141 = vector.extract_strided_slice %1 {offsets = [0, 8], sizes = [16, 1], strides = [1, 1]} : vector<16x9xf32> to vector<16x1xf32>
    %c239_i32_37 = arith.constant 239 : i32
    %142 = tpu.dynamic_rotate %11 by %c239_i32_37 dim 1 : vector<1x256xf32>, i32 -> vector<1x256xf32>
    %cst_38 = arith.constant 0.000000e+00 : f32
    %143 = vector.broadcast %cst_38 : f32 to vector<1x256xf32>
    %144 = arith.select %78, %142, %143 : vector<1x256xi1>, vector<1x256xf32>
    %145 = vector.broadcast %141 : vector<16x1xf32> to vector<16x256xf32>
    %146 = vector.broadcast %144 : vector<1x256xf32> to vector<16x256xf32>
    %147 = arith.mulf %145, %146 : vector<16x256xf32>
    %148 = arith.addf %140, %147 : vector<16x256xf32>
    %149 = arith.negf %148 : vector<16x256xf32>
    %150 = math.exp %149 : vector<16x256xf32>
    %cst_39 = arith.constant 1.000000e+00 : f32
    %151 = vector.broadcast %cst_39 : f32 to vector<16x256xf32>
    %152 = arith.addf %151, %150 : vector<16x256xf32>
    %153 = arith.divf %151, %152 : vector<16x256xf32>
    %154 = arith.mulf %148, %153 : vector<16x256xf32>
    %155 = vector.extract_strided_slice %2 {offsets = [0, 0], sizes = [16, 1], strides = [1, 1]} : vector<16x9xf32> to vector<16x1xf32>
    %c17_i32_40 = arith.constant 17 : i32
    %156 = tpu.dynamic_rotate %154 by %c17_i32_40 dim 1 : vector<16x256xf32>, i32 -> vector<16x256xf32>
    %cst_41 = arith.constant 0.000000e+00 : f32
    %157 = vector.shape_cast %49 : vector<1x256xi1> to vector<1x256xi1>
    %158 = vector.broadcast %157 : vector<1x256xi1> to vector<16x256xi1>
    %159 = vector.broadcast %cst_41 : f32 to vector<16x256xf32>
    %160 = arith.select %158, %156, %159 : vector<16x256xi1>, vector<16x256xf32>
    %161 = vector.broadcast %155 : vector<16x1xf32> to vector<16x256xf32>
    %162 = arith.mulf %161, %160 : vector<16x256xf32>
    %163 = vector.extract_strided_slice %2 {offsets = [0, 1], sizes = [16, 1], strides = [1, 1]} : vector<16x9xf32> to vector<16x1xf32>
    %c16_i32_42 = arith.constant 16 : i32
    %164 = tpu.dynamic_rotate %154 by %c16_i32_42 dim 1 : vector<16x256xf32>, i32 -> vector<16x256xf32>
    %cst_43 = arith.constant 0.000000e+00 : f32
    %165 = vector.shape_cast %51 : vector<1x256xi1> to vector<1x256xi1>
    %166 = vector.broadcast %165 : vector<1x256xi1> to vector<16x256xi1>
    %167 = vector.broadcast %cst_43 : f32 to vector<16x256xf32>
    %168 = arith.select %166, %164, %167 : vector<16x256xi1>, vector<16x256xf32>
    %169 = vector.broadcast %163 : vector<16x1xf32> to vector<16x256xf32>
    %170 = arith.mulf %169, %168 : vector<16x256xf32>
    %171 = arith.addf %162, %170 : vector<16x256xf32>
    %172 = vector.extract_strided_slice %2 {offsets = [0, 2], sizes = [16, 1], strides = [1, 1]} : vector<16x9xf32> to vector<16x1xf32>
    %c15_i32_44 = arith.constant 15 : i32
    %173 = tpu.dynamic_rotate %154 by %c15_i32_44 dim 1 : vector<16x256xf32>, i32 -> vector<16x256xf32>
    %cst_45 = arith.constant 0.000000e+00 : f32
    %174 = vector.shape_cast %56 : vector<1x256xi1> to vector<1x256xi1>
    %175 = vector.broadcast %174 : vector<1x256xi1> to vector<16x256xi1>
    %176 = vector.broadcast %cst_45 : f32 to vector<16x256xf32>
    %177 = arith.select %175, %173, %176 : vector<16x256xi1>, vector<16x256xf32>
    %178 = vector.broadcast %172 : vector<16x1xf32> to vector<16x256xf32>
    %179 = arith.mulf %178, %177 : vector<16x256xf32>
    %180 = arith.addf %171, %179 : vector<16x256xf32>
    %181 = vector.extract_strided_slice %2 {offsets = [0, 3], sizes = [16, 1], strides = [1, 1]} : vector<16x9xf32> to vector<16x1xf32>
    %c1_i32_46 = arith.constant 1 : i32
    %182 = tpu.dynamic_rotate %154 by %c1_i32_46 dim 1 : vector<16x256xf32>, i32 -> vector<16x256xf32>
    %cst_47 = arith.constant 0.000000e+00 : f32
    %183 = vector.shape_cast %61 : vector<1x256xi1> to vector<1x256xi1>
    %184 = vector.broadcast %183 : vector<1x256xi1> to vector<16x256xi1>
    %185 = vector.broadcast %cst_47 : f32 to vector<16x256xf32>
    %186 = arith.select %184, %182, %185 : vector<16x256xi1>, vector<16x256xf32>
    %187 = vector.broadcast %181 : vector<16x1xf32> to vector<16x256xf32>
    %188 = arith.mulf %187, %186 : vector<16x256xf32>
    %189 = arith.addf %180, %188 : vector<16x256xf32>
    %190 = vector.extract_strided_slice %2 {offsets = [0, 4], sizes = [16, 1], strides = [1, 1]} : vector<16x9xf32> to vector<16x1xf32>
    %191 = vector.broadcast %190 : vector<16x1xf32> to vector<16x256xf32>
    %192 = arith.mulf %191, %154 : vector<16x256xf32>
    %193 = arith.addf %189, %192 : vector<16x256xf32>
    %194 = vector.extract_strided_slice %2 {offsets = [0, 5], sizes = [16, 1], strides = [1, 1]} : vector<16x9xf32> to vector<16x1xf32>
    %c255_i32_48 = arith.constant 255 : i32
    %195 = tpu.dynamic_rotate %154 by %c255_i32_48 dim 1 : vector<16x256xf32>, i32 -> vector<16x256xf32>
    %cst_49 = arith.constant 0.000000e+00 : f32
    %196 = vector.shape_cast %66 : vector<1x256xi1> to vector<1x256xi1>
    %197 = vector.broadcast %196 : vector<1x256xi1> to vector<16x256xi1>
    %198 = vector.broadcast %cst_49 : f32 to vector<16x256xf32>
    %199 = arith.select %197, %195, %198 : vector<16x256xi1>, vector<16x256xf32>
    %200 = vector.broadcast %194 : vector<16x1xf32> to vector<16x256xf32>
    %201 = arith.mulf %200, %199 : vector<16x256xf32>
    %202 = arith.addf %193, %201 : vector<16x256xf32>
    %203 = vector.extract_strided_slice %2 {offsets = [0, 6], sizes = [16, 1], strides = [1, 1]} : vector<16x9xf32> to vector<16x1xf32>
    %c241_i32_50 = arith.constant 241 : i32
    %204 = tpu.dynamic_rotate %154 by %c241_i32_50 dim 1 : vector<16x256xf32>, i32 -> vector<16x256xf32>
    %cst_51 = arith.constant 0.000000e+00 : f32
    %205 = vector.shape_cast %71 : vector<1x256xi1> to vector<1x256xi1>
    %206 = vector.broadcast %205 : vector<1x256xi1> to vector<16x256xi1>
    %207 = vector.broadcast %cst_51 : f32 to vector<16x256xf32>
    %208 = arith.select %206, %204, %207 : vector<16x256xi1>, vector<16x256xf32>
    %209 = vector.broadcast %203 : vector<16x1xf32> to vector<16x256xf32>
    %210 = arith.mulf %209, %208 : vector<16x256xf32>
    %211 = arith.addf %202, %210 : vector<16x256xf32>
    %212 = vector.extract_strided_slice %2 {offsets = [0, 7], sizes = [16, 1], strides = [1, 1]} : vector<16x9xf32> to vector<16x1xf32>
    %c240_i32_52 = arith.constant 240 : i32
    %213 = tpu.dynamic_rotate %154 by %c240_i32_52 dim 1 : vector<16x256xf32>, i32 -> vector<16x256xf32>
    %cst_53 = arith.constant 0.000000e+00 : f32
    %214 = vector.shape_cast %73 : vector<1x256xi1> to vector<1x256xi1>
    %215 = vector.broadcast %214 : vector<1x256xi1> to vector<16x256xi1>
    %216 = vector.broadcast %cst_53 : f32 to vector<16x256xf32>
    %217 = arith.select %215, %213, %216 : vector<16x256xi1>, vector<16x256xf32>
    %218 = vector.broadcast %212 : vector<16x1xf32> to vector<16x256xf32>
    %219 = arith.mulf %218, %217 : vector<16x256xf32>
    %220 = arith.addf %211, %219 : vector<16x256xf32>
    %221 = vector.extract_strided_slice %2 {offsets = [0, 8], sizes = [16, 1], strides = [1, 1]} : vector<16x9xf32> to vector<16x1xf32>
    %c239_i32_54 = arith.constant 239 : i32
    %222 = tpu.dynamic_rotate %154 by %c239_i32_54 dim 1 : vector<16x256xf32>, i32 -> vector<16x256xf32>
    %cst_55 = arith.constant 0.000000e+00 : f32
    %223 = vector.shape_cast %78 : vector<1x256xi1> to vector<1x256xi1>
    %224 = vector.broadcast %223 : vector<1x256xi1> to vector<16x256xi1>
    %225 = vector.broadcast %cst_55 : f32 to vector<16x256xf32>
    %226 = arith.select %224, %222, %225 : vector<16x256xi1>, vector<16x256xf32>
    %227 = vector.broadcast %221 : vector<16x1xf32> to vector<16x256xf32>
    %228 = arith.mulf %227, %226 : vector<16x256xf32>
    %229 = arith.addf %220, %228 : vector<16x256xf32>
    %cst_56 = arith.constant dense<0.000000e+00> : vector<256xf32>
    %230 = vector.multi_reduction <add>, %229, %cst_56 [0] : vector<16x256xf32> to vector<256xf32>
    %231 = vector.shape_cast %230 : vector<256xf32> to vector<1x256xf32>
    %232 = vector.broadcast %3 : vector<1x1xf32> to vector<1x256xf32>
    %233 = arith.addf %231, %232 : vector<1x256xf32>
    %c0_57 = arith.constant 0 : index
    %c0_58 = arith.constant 0 : index
    %234 = vector.load %arg6[%c0_57, %c0_58] : memref<1x256xf32, #tpu.memory_space<vmem>>, vector<1x256xf32>
    tpu.vector_store %arg6[%c0_57, %c0_58], %233 {strides = array<i32>} : memref<1x256xf32, #tpu.memory_space<vmem>>, vector<1x256xf32>,
    return
  }
  func.func @transform_0(%arg0: i32) -> (i32, i32) {
    %c0_i32 = arith.constant 0 : i32
    %c0_i32_0 = arith.constant 0 : i32
    return %c0_i32, %arg0 : i32, i32
  }
  func.func @transform_1(%arg0: i32) -> (i32, i32) {
    %c0_i32 = arith.constant 0 : i32
    %c0_i32_0 = arith.constant 0 : i32
    return %c0_i32, %arg0 : i32, i32
  }
  func.func @transform_2(%arg0: i32) -> (i32, i32) {
    %c0_i32 = arith.constant 0 : i32
    %c0_i32_0 = arith.constant 0 : i32
    return %c0_i32, %arg0 : i32, i32
  }
  func.func @transform_3(%arg0: i32) -> (i32, i32) {
    %c0_i32 = arith.constant 0 : i32
    %c0_i32_0 = arith.constant 0 : i32
    return %c0_i32, %arg0 : i32, i32
  }
  func.func @transform_4(%arg0: i32) -> (i32, i32) {
    %c0_i32 = arith.constant 0 : i32
    %c0_i32_0 = arith.constant 0 : i32
    %c0_i32_1 = arith.constant 0 : i32
    return %c0_i32, %c0_i32_0 : i32, i32
  }
  func.func @transform_5(%arg0: i32) -> (i32, i32) {
    %c0_i32 = arith.constant 0 : i32
    %c0_i32_0 = arith.constant 0 : i32
    return %c0_i32, %arg0 : i32, i32
  }
}

</mosaic_0001>

<bundles_post_ra>
// kernel: _forward_impl.1
= control target key start
LH: loop header
LB: loop body
LE: loop exit
PB: predicated region body
PF: predicated region fallthrough
CT: control target
= control target key end

     0   :  { %s1393_s18 = smov 0   ;;  %s1395_s19 = smov 0   ;;  %s2054_s0 = inlined_call_operand.vmem [shape: f32[2,512], index: 0, kind: input, shape index: {}]   ;;  %s2055_s1 = inlined_call_operand.vmem [shape: f32[1,512], index: 1, kind: input, shape index: {}]   ;;  %s2056_s2 = inlined_call_operand.vmem [shape: f32[1,512], index: 2, kind: input, shape index: {}]   ;;  %s2057_s3 = inlined_call_operand.vmem [shape: f32[16,512], index: 3, kind: input, shape index: {}]   ;;  %s2058_s4 = inlined_call_operand.vmem [shape: f32[16,19], index: 4, kind: input, shape index: {}]   ;;  %s2059_s5 = inlined_call_operand.vmem [shape: f32[1,512], index: 5, kind: output, shape index: {}]  }
   0x1   :  { %s1397_s20 = smov 0  }
   0x2 LB: > { %s1186_s21 = sadd.s32 4294967295, %s1332_s20   ;;  %s1410_s22 = sadd.s32 1, %s1332_s20   ;;  %s1332_s20 = sphi %s1397_s20, %s2110_s20   ;;  %s1328_s19 = sphi %s1395_s19, %s2109_s19   ;;  %s1324_s18 = sphi %s1393_s18, %s2108_s18  }
   0x3   : > { %s97_s23 = ssub.s32 %s1332_s20, %s1410_s22  ;;  %s100_s24 = sadd.s32 1, %s1328_s19 }
   0x4   : > { %p98_p0 = scmp.eq.s32.totalorder %s97_s23, 0  ;;  %p107_p1 = scmp.ne.s32.totalorder %s1328_s19, %s1324_s18 }
   0x5   : > { %p108_p2 = scmp.eq.s32.totalorder %s1332_s20, 0  ;;  %p1189_p4 = scmp.ge.s32.totalorder %s1332_s20, 2 }
   0x6   : > { %s1419_s25 = scalar_select %p98_p0, %s1328_s19, %s100_s24  }
   0x7   : > { %p109_p3 = por %p108_p2, %p107_p1  ;;  %183 = sbr.rel (%p1189_p4) target bundleno = 18 (0x12), region = 20 }
   0xc   : > { %211 = sbr.rel (!%p109_p3) target bundleno = 18 (0x12), region = 36  ;;  %s213_s26 = sand.u32 (%p109_p3), 1, %s1328_s19  }
   0xd   : > { %s1207_s27 = sshll.u32 (%p109_p3), %s1332_s20, 4  ;;  %s1190_s28 = sshll.u32 (%p109_p3), %s213_s26, 5 }
   0xe   : > { %s218_s6 = scalar_lea.vmem (%p109_p3), %s2057_s3, %s1207_s27  ;;  %s215_s7 = scalar_lea.vmem (%p109_p3), [#allocation2], %s1190_s28 }
   0xf   : > { %v231_v0 = vld [vmem:[%s218_s6] sm:$0xff] (%p109_p3)  ;;  %v233_v1 = vld [vmem:[%s218_s6 + $0x8] sm:$0xff] (%p109_p3) }
  0x10   : > { %v235_v2 = vld [vmem:[%s218_s6 + $0x20] sm:$0xff] (%p109_p3)  ;;  %232 = vst [vmem:[%s215_s7] sm:$0xff] (%p109_p3), %v231_v0  ;;  %234 = vst [vmem:[%s215_s7 + $0x8] sm:$0xff] (%p109_p3), %v233_v1  ;;  %v237_v3 = vld [vmem:[%s218_s6 + $0x28] sm:$0xff] (%p109_p3) }
  0x11   : > { %236 = vst [vmem:[%s215_s7 + $0x10] sm:$0xff] %v235_v2  ;;  %238 = vst [vmem:[%s215_s7 + $0x18] sm:$0xff] %v237_v3 }
  0x12 PF: > { %p1193_p5 = scmp.ge.s32.totalorder %s1332_s20, 1  ;;  %p243_p6 = scmp.lt.s32.totalorder %s1332_s20, 3 }
  0x14   : > { %p244_p7 = pnand %p1193_p5, %p243_p6 }
  0x15   : > { %s1195_s10 = sshll.u32 (!%p244_p7), %s1186_s21, 1  ;;  %s1338_s27 = smov (!%p244_p7), 16  }
  0x16   : > { %247 = sbr.rel (%p244_p7) target bundleno = 488 (0x1e8), region = 59  ;;  %p290_p8 = scmp.lt.s32.totalorder (!%p244_p7), %s1195_s10, 3 }
  0x17   : > { %s1339_s28 = smov (!%p244_p7), 17   ;;  %s1340_s29 = smov (!%p244_p7), 15  }
  0x18   : > { %s1342_s30 = smov (!%p244_p7), 1   ;;  %s1346_s6 = smov (!%p244_p7), 127  }
  0x19   : > { %s1347_s7 = smov (!%p244_p7), 113   ;;  %s1350_s8 = smov (!%p244_p7), 111  }
  0x1a   : > { %s1352_s9 = smov (!%p244_p7), 112   ;;  %s250_s11 = sand.u32 (!%p244_p7), 1, %s1324_s18  }
  0x1b   : > { %v1432_v4 = vld [vmem:[%s2058_s4] sm:$0xff]  ;;  %v319_v5 = vlaneseq  ;;  %v1334_v6 = vmov 0   ;;  %v1335_v7 = vmov 1   ;;  %v1336_v8 = vmov 857870592   ;;  %v1444_v11 = vld [vmem:[%s2058_s4 + $0x8] sm:$0xff] }
  0x1c   : > { %1261 = vset.pattern.permute.xlu1 %v1334_v6  ;;  %1262 = vset.pattern.permute.xlu0 %v1335_v7  ;;  %v317_v9 = vunpack.c.l.s4 %v1336_v8  ;;  %s2112_s10 = smov (!%p290_p8, %s1195_s10), 3  ;;  %v1337_v15 = vmov 2   ;;  %v1341_v28 = vmov 3   ;;  %v1343_v29 = vmov 4   ;;  %s1194_s12 = sshll.u32 %s250_s11, 5 }
  0x1d   : > { %450 = vperm.xlu1 %1261, %v1432_v4   ;;  %484 = vperm.xlu0 %1262, %v1432_v4   ;;  %v1439_v10 = vshrl.u32 %v319_v5, 7  ;;  %s1196_s13 = sshll.u32 %s2112_s10, 1  ;;  %s298_s16 = scalar_lea.vmem %s2055_s1, %s2112_s10  ;;  %v1344_v30 = vmov 5   ;;  %v1345_v31 = vmov 6   ;;  %v1348_v32 = vmov 7  }
  0x1e   : > { %v318_v12 = vunpack.c.0.s8 %v317_v9  ;;  %s293_s21 = scalar_lea.vmem %s2054_s0, %s1196_s13  ;;  %s303_s26 = scalar_lea.vmem %s2056_s2, %s2112_s10  ;;  %v314_v13 = vld [vmem:[%s298_s16] sm:$0x3]  ;;  %v1349_v33 = vmov 8   ;;  %v1351_v34 = vmov 9   ;;  %v1353_v35 = vmov 10  }
  0x1f   : > { %v313_v16 = vld [vmem:[%s293_s21] sm:$0xf]  ;;  %v1464_v23 = vsub.s32 0, %v1439_v10  ;;  %v435_v24 = vsub.s32 2, %v1439_v10  ;;  %v1354_v36 = vmov 11   ;;  %v1355_v37 = vmov 13   ;;  %s309_s15 = scalar_lea.vmem %s2059_s5, %s2112_s10 }
  0x20   : > { %v321_v14 = vsub.s32 %v318_v12, %v1439_v10  ;;  %v325_v17 = vld [vmem:[%s303_s26] sm:$0x3]  ;;  %v1356_v38 = vmov 14   ;;  %v1357_v39 = vmov 12   ;;  %v1358_v40 = vmov 16   ;;  %s1567_s18 = scalar_lea.vmem [#allocation2], %s1194_s12 }
  0x21   : > { %455 = vperm.xlu1 %1261, %v1444_v11   ;;  %1265 = vset.pattern.permute.xlu0 %v1337_v15  ;;  %v1359_v41 = vmov 17   ;;  %v1360_v42 = vmov 15   ;;  %v1534_v43 = vand.u32 127, %v319_v5  ;;  %v427_v59 = vld [vmem:[%s1567_s18 + $0x18] sm:$0xff]  ;;  %v425_v12 = vld [vmem:[%s1567_s18 + $0x8] sm:$0xff] }
  0x22   : > { %v322_v18 = vrot.slane %v314_v13, %v321_v14  ;;  %v333_v19 = vrot.slane %v325_v17, %v321_v14 }
  0x23   : > { %v1542_v46 = vadd.s32 128, %v1534_v43  ;;  %vm443_vm0 = vcmp.lt.s32.totalorder %v1534_v43, 17  ;;  %vm478_vm2 = vcmp.lt.s32.totalorder %v1534_v43, 16  ;;  %vm511_vm3 = vcmp.lt.s32.totalorder %v1534_v43, 15 }
  0x24   : > { %v324_v20 = vmul.f32 %v322_v18, %v313_v16  ;;  %v335_v21 = vmul.f32 %v333_v19, %v313_v16  ;;  %vm2060_vm5 = vcmp.lt.s32.totalorder %v1534_v43, 1 }
  0x25   : > { %1263 = vset.pattern.permute.xlu1 %v1335_v7  ;;  %v379_v48 = vand.u32 15, %v1542_v46 }
  0x26   : > { %488 = vperm.xlu1 %1263, %v1444_v11   ;;  %v1200_v22 = vrot.slane %v335_v21, 9 }
  0x27   : > { %vm1554_vm1 = vcmp.ge.s32.totalorder %v379_v48, 1  ;;  %vm1577_vm4 = vcmp.le.s32.totalorder %v379_v48, 14 }
  0x28   : > { %v340_v25 = vadd.f32 %v1200_v22, %v324_v20 }
  0x2a   : > { %1264 = vset.pattern.permute.xlu1 %v1337_v15  ;;  %v1467_v26 = vrot.slane %v340_v25, %v435_v24  ;;  %v1470_v27 = vrot.slane %v340_v25, %v1464_v23 }
  0x2c   : > { %476 = vrot.lane.b32.xlu1 %v1467_v26, %s1338_s27  ;;  %439 = vrot.lane.b32.xlu0 %v1470_v27, %s1339_s28 }
  0x30   : > { %507 = vrot.lane.b32.xlu1 %v1470_v27, %s1340_s29  ;;  %441 = vrot.lane.b32.xlu0 %v1467_v26, %s1339_s28 }
  0x34   : > { %517 = vperm.xlu1 %1264, %v1432_v4   ;;  %474 = vrot.lane.b32.xlu0 %v1470_v27, %s1338_s27 }
  0x38   : > { %1266 = vset.pattern.permute.xlu1 %v1341_v28  ;;  %509 = vrot.lane.b32.xlu0 %v1467_v26, %s1340_s29 }
  0x39   : > { %550 = vperm.xlu1 %1266, %v1432_v4  }
  0x3c   : > { %521 = vperm.xlu0 %1265, %v1444_v11  }
  0x3d   : > { %554 = vperm.xlu1 %1266, %v1444_v11  }
  0x40   : > { %540 = vrot.lane.b32.xlu0 %v1470_v27, %s1342_s30 }
  0x41   : > { %542 = vrot.lane.b32.xlu1 %v1467_v26, %s1342_s30  ;;  %1267 = vset.pattern.permute.xlu0 %v1343_v29 }
  0x42   : > { %1268 = vset.pattern.permute.xlu1 %v1343_v29  ;;  %v588_v29 = vrot.slane %v1467_v26, %v1464_v23 }
  0x44   : > { %574 = vperm.xlu0 %1267, %v1432_v4  }
  0x45   : > { %578 = vperm.xlu1 %1268, %v1444_v11  }
  0x48   : > { %1270 = vset.pattern.permute.xlu0 %v1344_v30 }
  0x49   : > { %1269 = vset.pattern.permute.xlu1 %v1344_v30  ;;  %611 = vperm.xlu0 %1270, %v1444_v11  }
  0x4a   : > { %607 = vperm.xlu1 %1269, %v1432_v4  }
  0x4d   : > { %1271 = vset.pattern.permute.xlu0 %v1345_v31 }
  0x4e   : > { %597 = vrot.lane.b32.xlu1 %v1470_v27, %s1346_s6  ;;  %640 = vperm.xlu0 %1271, %v1432_v4  }
  0x4f   : > { %1272 = vset.pattern.permute.xlu1 %v1345_v31 }
  0x52   : > { %599 = vrot.lane.b32.xlu1 %v1467_v26, %s1346_s6  ;;  %632 = vrot.lane.b32.xlu0 %v1467_v26, %s1347_s7 }
  0x53   : > { %1274 = vset.pattern.permute.xlu0 %v1348_v32 }
  0x56   : > { %644 = vperm.xlu1 %1272, %v1444_v11   ;;  %677 = vperm.xlu0 %1274, %v1444_v11  }
  0x5a   : > { %630 = vrot.lane.b32.xlu1 %v1470_v27, %s1347_s7  ;;  %1275 = vset.pattern.permute.xlu0 %v1349_v33 }
  0x5b   : > { %1273 = vset.pattern.permute.xlu1 %v1348_v32  ;;  %706 = vperm.xlu0 %1275, %v1432_v4  }
  0x5e   : > { %673 = vperm.xlu1 %1273, %v1432_v4  }
  0x5f   : > { %698 = vrot.lane.b32.xlu0 %v1467_v26, %s1350_s8 }
  0x60   : > { %1278 = vset.pattern.permute.xlu0 %v1351_v34 }
  0x62   : > { %663 = vrot.lane.b32.xlu1 %v1470_v27, %s1352_s9 }
  0x63   : > { %1276 = vset.pattern.permute.xlu1 %v1349_v33  ;;  %782 = vperm.xlu0 %1278, %v1444_v11  }
  0x66   : > { %665 = vrot.lane.b32.xlu1 %v1467_v26, %s1352_s9  ;;  %v372_v26 = vand.u32 15, %v1534_v43 }
  0x67   : > { %1279 = vset.pattern.permute.xlu0 %v1353_v35 }
  0x68   : > { %810 = vperm.xlu0 %1279, %v1432_v4   ;;  %vm1624_vm7 = vcmp.ge.s32.totalorder %v372_v26, 1  ;;  %vm1639_vm9 = vcmp.le.s32.totalorder %v372_v26, 14 }
  0x6a   : > { %710 = vperm.xlu1 %1276, %v1444_v11  }
  0x6c   : > { %1282 = vset.pattern.permute.xlu0 %v1354_v36 }
  0x6d   : > { %850 = vperm.xlu0 %1282, %v1444_v11  }
  0x6e   : > { %696 = vrot.lane.b32.xlu1 %v1470_v27, %s1350_s8 }
  0x6f   : > { %1277 = vset.pattern.permute.xlu1 %v1351_v34 }
  0x71   : > { %1284 = vset.pattern.permute.xlu0 %v1355_v37 }
  0x72   : > { %778 = vperm.xlu1 %1277, %v1432_v4   ;;  %898 = vperm.xlu0 %1284, %v1432_v4  }
  0x76   : > { %1280 = vset.pattern.permute.xlu1 %v1353_v35  ;;  %1287 = vset.pattern.permute.xlu0 %v1356_v38 }
  0x77   : > { %814 = vperm.xlu1 %1280, %v1444_v11   ;;  %938 = vperm.xlu0 %1287, %v1444_v11  }
  0x7b   : > { %1281 = vset.pattern.permute.xlu1 %v1354_v36  ;;  %1289 = vset.pattern.permute.xlu0 %v1358_v40 }
  0x7c   : > { %846 = vperm.xlu1 %1281, %v1432_v4   ;;  %1006 = vperm.xlu0 %1289, %v1432_v4  }
  0x80   : > { %1283 = vset.pattern.permute.xlu1 %v1357_v39  ;;  %1292 = vset.pattern.permute.xlu0 %v1359_v41 }
  0x81   : > { %882 = vperm.xlu1 %1283, %v1432_v4   ;;  %1046 = vperm.xlu0 %1292, %v1444_v11  }
  0x85   : > { %886 = vperm.xlu1 %1283, %v1444_v11  }
  0x89   : > { %1285 = vset.pattern.permute.xlu1 %v1355_v37 }
  0x8a   : > { %902 = vperm.xlu1 %1285, %v1444_v11  }
  0x8e   : > { %1286 = vset.pattern.permute.xlu1 %v1356_v38 }
  0x8f   : > { %934 = vperm.xlu1 %1286, %v1432_v4  }
  0x93   : > { %1288 = vset.pattern.permute.xlu1 %v1360_v42 }
  0x94   : > { %970 = vperm.xlu1 %1288, %v1432_v4  }
  0x98   : > { %v1536_v44 = vpop.permute.xlu1 %450  ;;  %v1538_v45 = vpop.permute.xlu0 %484  ;;  %974 = vperm.xlu1 %1288, %v1444_v11  }
  0x9c   : > { %v1544_v47 = vpop.permute.xlu1 %455  ;;  %1290 = vset.pattern.permute.xlu1 %v1358_v40  ;;  %v1614_v40 = vand.u32 255, %v1534_v43 }
  0x9d   : > { %1010 = vperm.xlu1 %1290, %v1444_v11  }
  0x9e   : > { %v1548_v49 = vpop.permute.xlu0 %439  ;;  %vm392_vm6 = vcmp.ge.s32.totalorder %v1614_v40, 17  ;;  %vm398_vm10 = vcmp.ge.s32.totalorder %v1614_v40, 16  ;;  %vm400_vm11 = vcmp.ge.s32.totalorder %v1614_v40, 15  ;;  %vm406_vm12 = vcmp.ge.s32.totalorder %v1614_v40, 1 }
  0x9f   : > { %vm1632_vm8 = vmand %vm392_vm6, %vm1624_vm7  ;;  %vm2064_vm6 = vcmp.lt.s32.totalorder %v1534_v43, 127 }
  0xa0   : > { %vm1654_vm13 = vmand %vm400_vm11, %vm1639_vm9 }
  0xa1   : > { %v1551_v50 = vpop.permute.xlu1 %488  ;;  %1291 = vset.pattern.permute.xlu1 %v1359_v41  ;;  %vm1667_vm14 = vmand %vm406_vm12, %vm1624_vm7  ;;  %vm2061_vm12 = vcmp.lt.s32.totalorder %v1534_v43, 113 }
  0xa2   : > { %v442_v52 = vpop.permute.xlu0 %441  ;;  %1042 = vperm.xlu1 %1291, %v1432_v4  }
  0xa3   : > { %v444_v53 = vsel %vm443_vm0, %v1548_v49, %v442_v52 }
  0xa4   : > { %v447_v54 = vsel %vm1554_vm1, %v444_v53, 0.0 }
  0xa5   : > { %v465_v55 = vrot.slane %v447_v54, %v1464_v23  ;;  %v477_v56 = vpop.permute.xlu1 %476 }
  0xa6   : > { %v475_v57 = vpop.permute.xlu0 %474 }
  0xa7   : > { %v469_v58 = vmul.f32 %v465_v55, %v1544_v47  ;;  %v479_v60 = vsel %vm478_vm2, %v475_v57, %v477_v56  ;;  %v467_v11 = vmul.f32 %v465_v55, %v1536_v44 }
  0xa8   : > { %v498_v61 = vrot.slane %v479_v60, %v1464_v23 }
  0xa9   : > { %v473_v62 = vadd.f32 %v469_v58, %v427_v59  ;;  %v508_v0 = vpop.permute.xlu1 %507  ;;  %v471_v17 = vadd.f32 %v467_v11, %v425_v12  ;;  %v445_v59 = vsel %vm443_vm0, %v442_v52, %v1548_v49  ;;  %v1674_v12 = vand.u32 255, %v1542_v46 }
  0xaa   : > { %v502_v63 = vmul.f32 %v498_v61, %v1551_v50  ;;  %v510_v2 = vpop.permute.xlu0 %509  ;;  %v500_v16 = vmul.f32 %v498_v61, %v1538_v45 }
  0xab   : > { %v512_v7 = vsel %vm511_vm3, %v508_v0, %v510_v2  ;;  %vm411_vm15 = vcmp.lt.s32.totalorder %v1674_v12, 255  ;;  %vm415_vm11 = vcmp.lt.s32.totalorder %v1674_v12, 241 }
  0xac   : > { %v506_v1 = vadd.f32 %v502_v63, %v473_v62  ;;  %v515_v9 = vsel %vm1577_vm4, %v512_v7, 0.0  ;;  %v504_v24 = vadd.f32 %v500_v16, %v471_v17  ;;  %v480_v62 = vsel %vm478_vm2, %v477_v56, %v475_v57 }
  0xad   : > { %v531_v14 = vrot.slane %v515_v9, %v1464_v23  ;;  %v446_v63 = vsel %vm1632_vm8, %v445_v59, 0.0  ;;  %v481_v49 = vsel %vm398_vm10, %v480_v62, 0.0  ;;  %v513_v56 = vsel %vm511_vm3, %v510_v2, %v508_v0 }
  0xae   : > { %v461_v7 = vrot.slane %v446_v63, %v1464_v23  ;;  %v494_v0 = vrot.slane %v481_v49, %v1464_v23  ;;  %v514_v2 = vsel %vm1654_vm13, %v513_v56, 0.0  ;;  %v584_v62 = vrot.slane %v1470_v27, %v1464_v23 }
  0xaf   : > { %v1575_v3 = vpop.permute.xlu1 %517 }
  0xb0   : > { %v533_v19 = vmul.f32 %v531_v14, %v1575_v3  ;;  %v466_v16 = vmul.f32 %v461_v7, %v1536_v44  ;;  %v468_v17 = vmul.f32 %v461_v7, %v1544_v47 }
  0xb2   : > { %v537_v31 = vadd.f32 %v533_v19, %v504_v24  ;;  %v501_v24 = vmul.f32 %v494_v0, %v1551_v50 }
  0xb4   : > { %v1583_v8 = vpop.permute.xlu1 %550 }
  0xb7   : > { %v1589_v13 = vpop.permute.xlu0 %521 }
  0xb8   : > { %v1592_v15 = vpop.permute.xlu1 %554  ;;  %v535_v21 = vmul.f32 %v531_v14, %v1589_v13 }
  0xba   : > { %v539_v33 = vadd.f32 %v535_v21, %v506_v1  ;;  %v424_v21 = vld [vmem:[%s1567_s18] sm:$0xff] }
  0xbb   : > { %v541_v18 = vpop.permute.xlu0 %540 }
  0xbc   : > { %v543_v20 = vpop.permute.xlu1 %542 }
  0xbd   : > { %v545_v22 = vsel %vm2060_vm5, %v541_v18, %v543_v20  ;;  %v546_v11 = vsel %vm2060_vm5, %v543_v20, %v541_v18  ;;  %v426_v18 = vld [vmem:[%s1567_s18 + $0x10] sm:$0xff]  ;;  %v499_v20 = vmul.f32 %v494_v0, %v1538_v45  ;;  %vm1697_vm5 = vmand %vm411_vm15, %vm1577_vm4 }
  0xbe   : > { %v548_v25 = vsel %vm1554_vm1, %v545_v22, 0.0  ;;  %v547_v19 = vsel %vm1667_vm14, %v546_v11, 0.0  ;;  %v527_v22 = vrot.slane %v514_v2, %v1464_v23  ;;  %vm1711_vm15 = vmand %vm415_vm11, %vm1554_vm1  ;;  %vm2062_vm11 = vcmp.lt.s32.totalorder %v1534_v43, 112 }
  0xbf   : > { %v564_v28 = vrot.slane %v548_v25, %v1464_v23  ;;  %v1605_v30 = vpop.permute.xlu0 %574  ;;  %v560_v44 = vrot.slane %v547_v19, %v1464_v23  ;;  %v1361_v25 = vmov 18  }
  0xc0   : > { %v1607_v32 = vpop.permute.xlu1 %578  ;;  %v590_v36 = vmul.f32 %v588_v29, %v1605_v30  ;;  %1293 = vset.pattern.permute.xlu0 %v1361_v25  ;;  %v589_v27 = vmul.f32 %v584_v62, %v1605_v30 }
  0xc1   : > { %v566_v34 = vmul.f32 %v564_v28, %v1583_v8  ;;  %v568_v35 = vmul.f32 %v564_v28, %v1592_v15  ;;  %v592_v38 = vmul.f32 %v588_v29, %v1607_v32  ;;  %v470_v28 = vadd.f32 %v466_v16, %v424_v21 }
  0xc2   : > { %v472_v29 = vadd.f32 %v468_v17, %v426_v18 }
  0xc3   : > { %v572_v37 = vadd.f32 %v568_v35, %v539_v33  ;;  %v570_v39 = vadd.f32 %v566_v34, %v537_v31  ;;  %v532_v33 = vmul.f32 %v527_v22, %v1575_v3  ;;  %v534_v34 = vmul.f32 %v527_v22, %v1589_v13 }
  0xc4   : > { %v1628_v55 = vpop.permute.xlu0 %611  ;;  %v565_v3 = vmul.f32 %v560_v44, %v1583_v8  ;;  %v567_v13 = vmul.f32 %v560_v44, %v1592_v15  ;;  %v591_v22 = vmul.f32 %v584_v62, %v1607_v32 }
  0xc5   : > { %v1617_v41 = vadd.f32 %v592_v38, %v572_v37  ;;  %v1619_v42 = vadd.f32 %v590_v36, %v570_v39  ;;  %v1621_v48 = vpop.permute.xlu1 %607  ;;  %v503_v36 = vadd.f32 %v499_v20, %v470_v28  ;;  %v505_v37 = vadd.f32 %v501_v24, %v472_v29 }
  0xc7   : > { %v536_v63 = vadd.f32 %v532_v33, %v503_v36  ;;  %v538_v49 = vadd.f32 %v534_v34, %v505_v37 }
  0xc9   : > { %v598_v54 = vpop.permute.xlu1 %597  ;;  %v1660_v57 = vpop.permute.xlu0 %640  ;;  %v571_v11 = vadd.f32 %v567_v13, %v538_v49  ;;  %v569_v0 = vadd.f32 %v565_v3, %v536_v63 }
  0xcb   : > { %v595_v29 = vadd.f32 %v591_v22, %v571_v11  ;;  %v593_v32 = vadd.f32 %v589_v27, %v569_v0 }
  0xcd   : > { %v600_v60 = vpop.permute.xlu1 %599  ;;  %v633_v46 = vpop.permute.xlu0 %632 }
  0xce   : > { %v602_v45 = vsel %vm2064_vm6, %v598_v54, %v600_v60  ;;  %v603_v50 = vsel %vm2064_vm6, %v600_v60, %v598_v54 }
  0xcf   : > { %v604_v54 = vsel %vm1639_vm9, %v602_v45, 0.0  ;;  %v605_v59 = vsel %vm1697_vm5, %v603_v50, 0.0 }
  0xd0   : > { %v617_v15 = vrot.slane %v604_v54, %v1464_v23  ;;  %v621_v7 = vrot.slane %v605_v59, %v1464_v23 }
  0xd1   : > { %v1662_v1 = vpop.permute.xlu1 %644  ;;  %v678_v35 = vpop.permute.xlu0 %677 }
  0xd2   : > { %v623_v30 = vmul.f32 %v621_v7, %v1621_v48  ;;  %v624_v20 = vmul.f32 %v617_v15, %v1628_v55  ;;  %v625_v24 = vmul.f32 %v621_v7, %v1628_v55 }
  0xd4   : > { %v627_v36 = vadd.f32 %v623_v30, %v1619_v42  ;;  %v628_v37 = vadd.f32 %v624_v20, %v595_v29 }
  0xd5   : > { %v631_v14 = vpop.permute.xlu1 %630 }
  0xd6   : > { %v635_v39 = vsel %vm2061_vm12, %v631_v14, %v633_v46  ;;  %v636_v26 = vsel %vm2061_vm12, %v633_v46, %v631_v14  ;;  %vm2063_vm12 = vcmp.lt.s32.totalorder %v1674_v12, 240  ;;  %v707_v14 = vpop.permute.xlu0 %706  ;;  %v622_v46 = vmul.f32 %v617_v15, %v1621_v48 }
  0xd7   : > { %v637_v56 = vsel %vm1624_vm7, %v635_v39, 0.0  ;;  %v638_v8 = vsel %vm1711_vm15, %v636_v26, 0.0  ;;  %v629_v39 = vadd.f32 %v625_v24, %v1617_v41 }
  0xd8   : > { %v650_v16 = vrot.slane %v637_v56, %v1464_v23  ;;  %v654_v17 = vrot.slane %v638_v8, %v1464_v23  ;;  %v626_v34 = vadd.f32 %v622_v46, %v593_v32 }
  0xd9   : > { %v1693_v47 = vpop.permute.xlu1 %673 }
  0xda   : > { %v655_v45 = vmul.f32 %v650_v16, %v1660_v57  ;;  %v656_v50 = vmul.f32 %v654_v17, %v1660_v57  ;;  %v657_v33 = vmul.f32 %v650_v16, %v1662_v1  ;;  %v658_v48 = vmul.f32 %v654_v17, %v1662_v1  ;;  %v699_v55 = vpop.permute.xlu0 %698 }
  0xdc   : > { %v659_v59 = vadd.f32 %v655_v45, %v626_v34  ;;  %v661_v62 = vadd.f32 %v657_v33, %v628_v37  ;;  %v662_v63 = vadd.f32 %v658_v48, %v629_v39 }
  0xdd   : > { %v664_v60 = vpop.permute.xlu1 %663 }
  0xe1   : > { %v666_v2 = vpop.permute.xlu1 %665 }
  0xe2   : > { %v668_v19 = vsel %vm2062_vm11, %v664_v60, %v666_v2  ;;  %v669_v21 = vsel %vm2062_vm11, %v666_v2, %v664_v60  ;;  %vm421_vm11 = vcmp.lt.s32.totalorder %v1674_v12, 239  ;;  %v660_v60 = vadd.f32 %v656_v50, %v627_v36 }
  0xe3   : > { %v671_v18 = vsel %vm2063_vm12, %v669_v21, 0.0  ;;  %v683_v44 = vrot.slane %v668_v19, %v1464_v23  ;;  %vm2065_vm12 = vcmp.lt.s32.totalorder %v1534_v43, 111  ;;  %vm1761_vm6 = vmand %vm421_vm11, %vm1577_vm4  ;;  %vm2086_vm11 = vcmp.lt.s32.totalorder %v1534_v43, 1 }
  0xe4   : > { %v687_v25 = vrot.slane %v671_v18, %v1464_v23 }
  0xe5   : > { %v711_v28 = vpop.permute.xlu1 %710  ;;  %v688_v57 = vmul.f32 %v683_v44, %v1693_v47  ;;  %v690_v1 = vmul.f32 %v683_v44, %v678_v35 }
  0xe6   : > { %v689_v3 = vmul.f32 %v687_v25, %v1693_v47  ;;  %v691_v13 = vmul.f32 %v687_v25, %v678_v35 }
  0xe7   : > { %v692_v8 = vadd.f32 %v688_v57, %v659_v59  ;;  %v694_v7 = vadd.f32 %v690_v1, %v661_v62 }
  0xe8   : > { %v693_v15 = vadd.f32 %v689_v3, %v660_v60  ;;  %v695_v11 = vadd.f32 %v691_v13, %v662_v63  ;;  %v1855_v60 = vpop.permute.xlu0 %782 }
  0xe9   : > { %v697_v54 = vpop.permute.xlu1 %696 }
  0xea   : > { %v701_v42 = vsel %vm2065_vm12, %v697_v54, %v699_v55  ;;  %v702_v41 = vsel %vm2065_vm12, %v699_v55, %v697_v54  ;;  %vm2087_vm12 = vmmov %vm2086_vm11 }
  0xeb   : > { %v703_v49 = vsel %vm1639_vm9, %v701_v42, 0.0  ;;  %v704_v56 = vsel %vm1761_vm6, %v702_v41, 0.0 }
  0xec   : > { %v716_v47 = vrot.slane %v703_v49, %v1464_v23  ;;  %v720_v35 = vrot.slane %v704_v56, %v1464_v23  ;;  %v811_v42 = vpop.permute.xlu0 %810 }
  0xed   : > { %v1777_v24 = vpop.permute.xlu1 %778 }
  0xee   : > { %v721_v0 = vmul.f32 %v716_v47, %v707_v14  ;;  %v722_v27 = vmul.f32 %v720_v35, %v707_v14  ;;  %v723_v2 = vmul.f32 %v716_v47, %v711_v28  ;;  %v724_v16 = vmul.f32 %v720_v35, %v711_v28 }
  0xf0   : > { %v725_v17 = vadd.f32 %v721_v0, %v692_v8  ;;  %v726_v19 = vadd.f32 %v722_v27, %v693_v15  ;;  %v727_v21 = vadd.f32 %v723_v2, %v694_v7  ;;  %v728_v22 = vadd.f32 %v724_v16, %v695_v11  ;;  %v1859_v62 = vpop.permute.xlu0 %850 }
  0xf2   : > { %v1201_v18 = vmul.f32 -1.442695, %v725_v17  ;;  %v1202_v46 = vmul.f32 -1.442695, %v726_v19  ;;  %v1203_v30 = vmul.f32 -1.442695, %v727_v21  ;;  %v1779_v23 = vpop.permute.xlu1 %814 }
  0xf3   : > { %v1204_v20 = vmul.f32 -1.442695, %v728_v22 }
  0xf4   : > { %1294 = vpow2.f32 %v1201_v18  ;;  %v899_v49 = vpop.permute.xlu0 %898 }
  0xf5   : > { %1296 = vpow2.f32 %v1202_v46 }
  0xf6   : > { %1298 = vpow2.f32 %v1203_v30 }
  0xf7   : > { %1300 = vpow2.f32 %v1204_v20  ;;  %v1781_v14 = vpop.permute.xlu1 %846 }
  0xfc   : > { %v1783_v48 = vpop.permute.xlu1 %882 }
 0x100   : > { %v1785_v55 = vpop.permute.xlu1 %886 }
 0x101   : > { %v1295_v44 = vpop.eup %1294 }
 0x102   : > { %v1297_v25 = vpop.eup %1296  ;;  %v741_v28 = vadd.f32 1.0, %v1295_v44 }
 0x103   : > { %v1299_v29 = vpop.eup %1298  ;;  %v742_v32 = vadd.f32 1.0, %v1297_v25 }
 0x104   : > { %v1301_v45 = vpop.eup %1300  ;;  %v743_v50 = vadd.f32 1.0, %v1299_v29  ;;  %1302 = vrcp.f32 %v741_v28 }
 0x105   : > { %v744_v33 = vadd.f32 1.0, %v1301_v45  ;;  %1304 = vrcp.f32 %v742_v32  ;;  %v1789_v57 = vpop.permute.xlu1 %902 }
 0x106   : > { %1306 = vrcp.f32 %v743_v50 }
 0x107   : > { %1308 = vrcp.f32 %v744_v33 }
 0x10a   : > { %v1857_v41 = vpop.permute.xlu1 %934 }
 0x10f   : > { %v1861_v63 = vpop.permute.xlu1 %970 }
 0x111   : > { %v1303_v34 = vpop.eup %1302 }
 0x112   : > { %v1305_v36 = vpop.eup %1304  ;;  %v1787_v37 = vmul.f32 %v1303_v34, %v725_v17 }
 0x113   : > { %v1307_v39 = vpop.eup %1306  ;;  %v1793_v13 = vmul.f32 %v1305_v36, %v726_v19  ;;  %v1863_v56 = vpop.permute.xlu1 %974 }
 0x114   : > { %v755_v3 = vmul.f32 %v1307_v39, %v727_v21  ;;  %757 = vrot.lane.b32.xlu1 %v1787_v37, %s1339_s28  ;;  %v1309_v1 = vpop.eup %1308 }
 0x115   : > { %v1799_v59 = vmul.f32 %v1309_v1, %v728_v22 }
 0x116   : > { %v1796_v54 = vmul.f32 %v1789_v57, %v755_v3  ;;  %759 = vrot.lane.b32.xlu0 %v755_v3, %s1339_s28 }
 0x118   : > { %761 = vrot.lane.b32.xlu1 %v1793_v13, %s1339_s28  ;;  %v1867_v47 = vpop.permute.xlu1 %1010 }
 0x11a   : > { %763 = vrot.lane.b32.xlu0 %v1799_v59, %s1339_s28 }
 0x11c   : > { %789 = vrot.lane.b32.xlu1 %v1787_v37, %s1338_s27 }
 0x11d   : > { %v1871_v8 = vpop.permute.xlu1 %1042 }
 0x11e   : > { %793 = vrot.lane.b32.xlu0 %v1793_v13, %s1338_s27 }
 0x120   : > { %791 = vrot.lane.b32.xlu1 %v755_v3, %s1338_s27 }
 0x122   : > { %827 = vrot.lane.b32.xlu0 %v755_v3, %s1340_s29 }
 0x124   : > { %795 = vrot.lane.b32.xlu1 %v1799_v59, %s1338_s27 }
 0x126   : > { %831 = vrot.lane.b32.xlu0 %v1799_v59, %s1340_s29 }
 0x128   : > { %825 = vrot.lane.b32.xlu1 %v1787_v37, %s1340_s29 }
 0x12a   : > { %863 = vrot.lane.b32.xlu0 %v755_v3, %s1342_s30 }
 0x12c   : > { %829 = vrot.lane.b32.xlu1 %v1793_v13, %s1340_s29 }
 0x12e   : > { %867 = vrot.lane.b32.xlu0 %v1799_v59, %s1342_s30 }
 0x130   : > { %861 = vrot.lane.b32.xlu1 %v1787_v37, %s1342_s30 }
 0x132   : > { %913 = vrot.lane.b32.xlu0 %v1787_v37, %s1346_s6 }
 0x134   : > { %865 = vrot.lane.b32.xlu1 %v1793_v13, %s1342_s30 }
 0x136   : > { %917 = vrot.lane.b32.xlu0 %v1793_v13, %s1346_s6 }
 0x138   : > { %915 = vrot.lane.b32.xlu1 %v755_v3, %s1346_s6 }
 0x13a   : > { %951 = vrot.lane.b32.xlu0 %v755_v3, %s1347_s7 }
 0x13c   : > { %919 = vrot.lane.b32.xlu1 %v1799_v59, %s1346_s6 }
 0x13e   : > { %955 = vrot.lane.b32.xlu0 %v1799_v59, %s1347_s7 }
 0x140   : > { %949 = vrot.lane.b32.xlu1 %v1787_v37, %s1347_s7 }
 0x142   : > { %989 = vrot.lane.b32.xlu0 %v1793_v13, %s1352_s9 }
 0x144   : > { %953 = vrot.lane.b32.xlu1 %v1793_v13, %s1347_s7 }
 0x146   : > { %1021 = vrot.lane.b32.xlu0 %v1787_v37, %s1350_s8 }
 0x148   : > { %985 = vrot.lane.b32.xlu1 %v1787_v37, %s1352_s9 }
 0x14a   : > { %1025 = vrot.lane.b32.xlu0 %v1793_v13, %s1350_s8 }
 0x14c   : > { %987 = vrot.lane.b32.xlu1 %v755_v3, %s1352_s9 }
 0x14e   : > { %1072 = vperm.xlu0 %1293, %v1432_v4   ;;  %v1865_v4 = vpop.permute.xlu0 %938 }
 0x150   : > { %991 = vrot.lane.b32.xlu1 %v1799_v59, %s1352_s9 }
 0x152   : > { %v1869_v35 = vpop.permute.xlu0 %1006 }
 0x154   : > { %1023 = vrot.lane.b32.xlu1 %v755_v3, %s1350_s8 }
 0x156   : > { %v1873_v15 = vpop.permute.xlu0 %1046 }
 0x158   : > { %1027 = vrot.lane.b32.xlu1 %v1799_v59, %s1350_s8 }
 0x186   : > { %v758_v7 = vpop.permute.xlu1 %757 }
 0x188   : > { %v760_v11 = vpop.permute.xlu0 %759 }
 0x18a   : > { %v762_v0 = vpop.permute.xlu1 %761 }
 0x18b   : > { %v765_v44 = vsel %vm443_vm0, %v758_v7, %v762_v0  ;;  %v767_v25 = vsel %vm443_vm0, %v762_v0, %v758_v7 }
 0x18c   : > { %v764_v27 = vpop.permute.xlu0 %763  ;;  %v773_v33 = vsel %vm1632_vm8, %v767_v25, 0.0  ;;  %v774_v34 = vsel %vm1554_vm1, %v765_v44, 0.0 }
 0x18e   : > { %v790_v2 = vpop.permute.xlu1 %789 }
 0x190   : > { %v794_v16 = vpop.permute.xlu0 %793 }
 0x191   : > { %v799_v30 = vsel %vm478_vm2, %v794_v16, %v790_v2  ;;  %v797_v32 = vsel %vm478_vm2, %v790_v2, %v794_v16  ;;  %v785_v2 = vmul.f32 %v1777_v24, %v773_v33  ;;  %v786_v16 = vmul.f32 %v1777_v24, %v774_v34 }
 0x192   : > { %v792_v17 = vpop.permute.xlu1 %791  ;;  %v805_v45 = vsel %vm398_vm10, %v799_v30, 0.0  ;;  %v818_v7 = vmul.f32 %v811_v42, %v797_v32 }
 0x193   : > { %v817_v1 = vmul.f32 %v811_v42, %v805_v45 }
 0x194   : > { %v828_v19 = vpop.permute.xlu0 %827  ;;  %v822_v25 = vadd.f32 %v818_v7, %v786_v16 }
 0x195   : > { %v821_v44 = vadd.f32 %v817_v1, %v785_v2  ;;  %v906_v1 = vmul.f32 %v899_v49, %v1793_v13 }
 0x196   : > { %v796_v21 = vpop.permute.xlu1 %795 }
 0x198   : > { %v832_v22 = vpop.permute.xlu0 %831 }
 0x19a   : > { %v826_v18 = vpop.permute.xlu1 %825 }
 0x19c   : > { %v864_v46 = vpop.permute.xlu0 %863 }
 0x19e   : > { %v830_v20 = vpop.permute.xlu1 %829 }
 0x19f   : > { %v833_v28 = vsel %vm511_vm3, %v826_v18, %v830_v20  ;;  %v835_v29 = vsel %vm511_vm3, %v830_v20, %v826_v18 }
 0x1a0   : > { %v868_v50 = vpop.permute.xlu0 %867  ;;  %v841_v36 = vsel %vm1654_vm13, %v835_v29, 0.0  ;;  %v842_v39 = vsel %vm1577_vm4, %v833_v28, 0.0 }
 0x1a1   : > { %v853_v18 = vmul.f32 %v1781_v14, %v841_v36  ;;  %v854_v30 = vmul.f32 %v1781_v14, %v842_v39  ;;  %v905_v39 = vmul.f32 %v899_v49, %v1787_v37  ;;  %v798_v37 = vsel %vm478_vm2, %v792_v17, %v796_v21 }
 0x1a2   : > { %v862_v3 = vpop.permute.xlu1 %861 }
 0x1a3   : > { %v857_v32 = vadd.f32 %v853_v18, %v821_v44  ;;  %v858_v33 = vadd.f32 %v854_v30, %v822_v25  ;;  %v766_v18 = vsel %vm443_vm0, %v760_v11, %v764_v27  ;;  %v768_v30 = vsel %vm443_vm0, %v764_v27, %v760_v11  ;;  %vm2089_vm0 = vmmov %vm2086_vm11 }
 0x1a4   : > { %v914_v0 = vpop.permute.xlu0 %913  ;;  %v775_v49 = vsel %vm1632_vm8, %v768_v30, 0.0  ;;  %v776_v25 = vsel %vm1554_vm1, %v766_v18, 0.0  ;;  %v836_v11 = vsel %vm511_vm3, %v832_v22, %v828_v19  ;;  %vm2091_vm8 = vmmov %vm2089_vm0 }
 0x1a5   : > { %v788_v40 = vmul.f32 %v1855_v60, %v776_v25 }
 0x1a6   : > { %v866_v20 = vpop.permute.xlu1 %865 }
 0x1a7   : > { %v869_v29 = vsel %vm2086_vm11, %v862_v3, %v866_v20  ;;  %v871_v28 = vsel %vm2087_vm12, %v866_v20, %v862_v3  ;;  %vm2088_vm12 = vcmp.lt.s32.totalorder %v1534_v43, 127  ;;  %vm2098_vm11 = vcmp.lt.s32.totalorder %v1674_v12, 240 }
 0x1a8   : > { %v918_v45 = vpop.permute.xlu0 %917  ;;  %v877_v42 = vsel %vm1667_vm14, %v871_v28, 0.0  ;;  %v878_v24 = vsel %vm1554_vm1, %v869_v29, 0.0  ;;  %v834_v29 = vsel %vm511_vm3, %v828_v19, %v832_v22  ;;  %v787_v19 = vmul.f32 %v1855_v60, %v775_v49 }
 0x1a9   : > { %v889_v14 = vmul.f32 %v1783_v48, %v877_v42  ;;  %v890_v34 = vmul.f32 %v1783_v48, %v878_v24  ;;  %v800_v48 = vsel %vm478_vm2, %v796_v21, %v792_v17  ;;  %v921_v13 = vsel %vm2088_vm12, %v914_v0, %v918_v45  ;;  %vm2090_vm2 = vmmov %vm2088_vm12 }
 0x1aa   : > { %v916_v36 = vpop.permute.xlu1 %915  ;;  %v807_v42 = vsel %vm398_vm10, %v800_v48, 0.0  ;;  %v872_v17 = vsel %vm2089_vm0, %v868_v50, %v864_v46  ;;  %v923_v58 = vsel %vm2090_vm2, %v918_v45, %v914_v0  ;;  %v820_v21 = vmul.f32 %v1779_v23, %v798_v37 }
 0x1ab   : > { %v893_v7 = vadd.f32 %v889_v14, %v857_v32  ;;  %v894_v3 = vadd.f32 %v890_v34, %v858_v33  ;;  %v870_v24 = vsel %vm2091_vm8, %v864_v46, %v868_v50  ;;  %v929_v32 = vsel %vm1639_vm9, %v921_v13, 0.0 }
 0x1ac   : > { %v1913_v2 = vpop.permute.xlu0 %951  ;;  %v843_v22 = vsel %vm1654_vm13, %v836_v11, 0.0  ;;  %v844_v14 = vsel %vm1577_vm4, %v834_v29, 0.0  ;;  %v819_v0 = vmul.f32 %v1779_v23, %v807_v42  ;;  %v879_v45 = vsel %vm1667_vm14, %v872_v17, 0.0  ;;  %vm2096_vm13 = vmmov %vm2090_vm2 }
 0x1ad   : > { %v909_v16 = vadd.f32 %v905_v39, %v893_v7  ;;  %v910_v20 = vadd.f32 %v906_v1, %v894_v3  ;;  %v930_v46 = vsel %vm1697_vm5, %v923_v58, 0.0  ;;  %v880_v34 = vsel %vm1554_vm1, %v870_v24, 0.0  ;;  %vm2097_vm14 = vmmov %vm2090_vm2 }
 0x1ae   : > { %v920_v28 = vpop.permute.xlu1 %919  ;;  %v941_v60 = vmul.f32 %v1857_v41, %v929_v32  ;;  %vm2092_vm3 = vcmp.lt.s32.totalorder %v1534_v43, 113  ;;  %v855_v23 = vmul.f32 %v1859_v62, %v843_v22  ;;  %v824_v39 = vadd.f32 %v820_v21, %v788_v40 }
 0x1af   : > { %vm2093_vm10 = vmmov %vm2092_vm3  ;;  %v942_v51 = vmul.f32 %v1857_v41, %v930_v46  ;;  %v856_v48 = vmul.f32 %v1859_v62, %v844_v14  ;;  %v823_v37 = vadd.f32 %v819_v0, %v787_v19  ;;  %v891_v13 = vmul.f32 %v1785_v55, %v879_v45 }
 0x1b0   : > { %v1921_v44 = vpop.permute.xlu0 %955  ;;  %v945_v3 = vadd.f32 %v941_v60, %v909_v16  ;;  %v892_v49 = vmul.f32 %v1785_v55, %v880_v34  ;;  %vm2094_vm1 = vcmp.lt.s32.totalorder %v1534_v43, 112  ;;  %v922_v16 = vsel %vm2096_vm13, %v916_v36, %v920_v28  ;;  %vm2101_vm2 = vmmov %vm2092_vm3 }
 0x1b1   : > { %v946_v11 = vadd.f32 %v942_v51, %v910_v20  ;;  %vm2095_vm4 = vmmov %vm2094_vm1  ;;  %v924_v62 = vsel %vm2097_vm14, %v920_v28, %v916_v36  ;;  %vm2099_vm12 = vcmp.lt.s32.totalorder %v1534_v43, 111  ;;  %v860_v24 = vadd.f32 %v856_v48, %v824_v39 }
 0x1b2   : > { %v950_v27 = vpop.permute.xlu1 %949  ;;  %vm2100_vm0 = vmmov %vm2099_vm12  ;;  %v859_v19 = vadd.f32 %v855_v23, %v823_v37  ;;  %v931_v0 = vsel %vm1639_vm9, %v922_v16, 0.0  ;;  %v908_v60 = vmul.f32 %v1789_v57, %v1799_v59 }
 0x1b3   : > { %v896_v46 = vadd.f32 %v892_v49, %v860_v24  ;;  %vm2102_vm8 = vmmov %vm2101_vm2  ;;  %v943_v31 = vmul.f32 %v1865_v4, %v931_v0 }
 0x1b4   : > { %v990_v33 = vpop.permute.xlu0 %989  ;;  %v895_v45 = vadd.f32 %v891_v13, %v859_v19 }
 0x1b5   : > { %v912_v59 = vadd.f32 %v908_v60, %v896_v46 }
 0x1b6   : > { %v954_v50 = vpop.permute.xlu1 %953  ;;  %v911_v57 = vadd.f32 %v1796_v54, %v895_v45 }
 0x1b7   : > { %v957_v52 = vsel %vm2092_vm3, %v950_v27, %v954_v50  ;;  %v959_v6 = vsel %vm2093_vm10, %v954_v50, %v950_v27  ;;  %vm2104_vm3 = vmmov %vm2094_vm1 }
 0x1b8   : > { %v1022_v9 = vpop.permute.xlu0 %1021  ;;  %v965_v1 = vsel %vm1624_vm7, %v957_v52, 0.0  ;;  %v966_v7 = vsel %vm1711_vm15, %v959_v6, 0.0  ;;  %v958_v52 = vsel %vm2101_vm2, %v1913_v2, %v1921_v44  ;;  %v960_v6 = vsel %vm2102_vm8, %v1921_v44, %v1913_v2  ;;  %vm2105_vm10 = vmmov %vm2098_vm11 }
 0x1b9   : > { %v977_v18 = vmul.f32 %v1861_v63, %v965_v1  ;;  %v978_v30 = vmul.f32 %v1861_v63, %v966_v7  ;;  %v968_v1 = vsel %vm1711_vm15, %v960_v6, 0.0  ;;  %vm2107_vm15 = vmmov %vm2100_vm0 }
 0x1ba   : > { %v986_v25 = vpop.permute.xlu1 %985  ;;  %v980_v54 = vmul.f32 %v1863_v56, %v968_v1 }
 0x1bb   : > { %v981_v27 = vadd.f32 %v977_v18, %v945_v3  ;;  %v993_v29 = vsel %vm2094_vm1, %v986_v25, %v990_v33  ;;  %v995_v41 = vsel %vm2095_vm4, %v990_v33, %v986_v25  ;;  %v982_v20 = vadd.f32 %v978_v30, %v946_v11 }
 0x1bc   : > { %v1026_v63 = vpop.permute.xlu0 %1025  ;;  %v1002_v42 = vsel %vm2098_vm11, %v995_v41, 0.0  ;;  %v1013_v55 = vmul.f32 %v1869_v35, %v993_v29 }
 0x1bd   : > { %v1029_v17 = vsel %vm2099_vm12, %v1022_v9, %v1026_v63  ;;  %v1031_v58 = vsel %vm2100_vm0, %v1026_v63, %v1022_v9  ;;  %v1014_v21 = vmul.f32 %v1869_v35, %v1002_v42  ;;  %v932_v35 = vsel %vm1697_vm5, %v924_v62, 0.0  ;;  %vm2103_vm5 = vmmov %vm2094_vm1 }
 0x1be   : > { %v1037_v32 = vsel %vm1639_vm9, %v1029_v17, 0.0  ;;  %v1038_v36 = vsel %vm1761_vm6, %v1031_v58, 0.0  ;;  %v1017_v28 = vadd.f32 %v1013_v55, %v981_v27  ;;  %v988_v33 = vpop.permute.xlu1 %987  ;;  %v944_v23 = vmul.f32 %v1865_v4, %v932_v35 }
 0x1bf   : > { %v1049_v40 = vmul.f32 %v1871_v8, %v1037_v32  ;;  %v1050_v22 = vmul.f32 %v1871_v8, %v1038_v36  ;;  %v1018_v14 = vadd.f32 %v1014_v21, %v982_v20  ;;  %v967_v9 = vsel %vm1624_vm7, %v958_v52, 0.0  ;;  %vm2106_vm7 = vmmov %vm2100_vm0 }
 0x1c0   : > { %v947_v4 = vadd.f32 %v943_v31, %v911_v57  ;;  %v948_v51 = vadd.f32 %v944_v23, %v912_v59  ;;  %v979_v3 = vmul.f32 %v1863_v56, %v967_v9  ;;  %v1362_v55 = vmov 1966171168  }
 0x1c1   : > { %v1053_v50 = vadd.f32 %v1049_v40, %v1017_v28  ;;  %v1054_v34 = vadd.f32 %v1050_v22, %v1018_v14  ;;  %v1081_v61 = vunpack.c.l.s4 %v1362_v55 }
 0x1c2   : > { %v992_v8 = vpop.permute.xlu1 %991  ;;  %v983_v38 = vadd.f32 %v979_v3, %v947_v4  ;;  %v984_v48 = vadd.f32 %v980_v54, %v948_v51 }
 0x1c3   : > { %v996_v39 = vsel %vm2103_vm5, %v992_v8, %v988_v33  ;;  %v994_v7 = vsel %vm2104_vm3, %v988_v33, %v992_v8  ;;  %v1082_v21 = vunpack.c.0.s8 %v1081_v61 }
 0x1c4   : > { %v1004_v2 = vsel %vm2105_vm10, %v996_v39, 0.0  ;;  %v1015_v18 = vmul.f32 %v1867_v47, %v994_v7 }
 0x1c5   : > { %v1016_v53 = vmul.f32 %v1867_v47, %v1004_v2  ;;  %v1085_v33 = vsub.s32 %v1082_v21, %v1439_v10 }
 0x1c6   : > { %v1024_v44 = vpop.permute.xlu1 %1023  ;;  %v1019_v56 = vadd.f32 %v1015_v18, %v983_v38 }
 0x1c7   : > { %v1020_v25 = vadd.f32 %v1016_v53, %v984_v48 }
 0x1c9   : > { %v1073_v36 = vpop.permute.xlu0 %1072 }
 0x1ca   : > { %v1028_v30 = vpop.permute.xlu1 %1027 }
 0x1cb   : > { %v1030_v37 = vsel %vm2106_vm7, %v1024_v44, %v1028_v30  ;;  %v1032_v12 = vsel %vm2107_vm15, %v1028_v30, %v1024_v44 }
 0x1cc   : > { %v1039_v13 = vsel %vm1639_vm9, %v1030_v37, 0.0  ;;  %v1040_v49 = vsel %vm1761_vm6, %v1032_v12, 0.0  ;;  %vm1097_vm9 = vcmp.lt.s32.totalorder %v319_v5, 256 }
 0x1cd   : > { %v1051_v11 = vmul.f32 %v1873_v15, %v1039_v13  ;;  %v1052_v47 = vmul.f32 %v1873_v15, %v1040_v49 }
 0x1cf   : > { %v1055_v27 = vadd.f32 %v1051_v11, %v1019_v56  ;;  %v1056_v29 = vadd.f32 %v1052_v47, %v1020_v25 }
 0x1d1   : > { %v1057_v41 = vadd.f32 %v1055_v27, %v1053_v50  ;;  %v1064_v16 = vadd.f32 %v1056_v29, %v1054_v34 }
 0x1d3   : > { %v1058_v62 = vrot.slane %v1057_v41, 4  ;;  %v1065_v63 = vrot.slane %v1064_v16, 4 }
 0x1d5   : > { %v1059_v43 = vadd.f32 %v1058_v62, %v1057_v41  ;;  %v1066_v42 = vadd.f32 %v1065_v63, %v1064_v16 }
 0x1d7   : > { %v1060_v20 = vrot.slane %v1059_v43, 2  ;;  %v1067_v26 = vrot.slane %v1066_v42, 2 }
 0x1d9   : > { %v1061_v17 = vadd.f32 %v1060_v20, %v1059_v43  ;;  %v1068_v58 = vadd.f32 %v1067_v26, %v1066_v42 }
 0x1db   : > { %v1062_v24 = vrot.slane %v1061_v17, 1  ;;  %v1069_v32 = vrot.slane %v1068_v58, 1 }
 0x1dd   : > { %v1063_v15 = vadd.f32 %v1062_v24, %v1061_v17  ;;  %v1070_v28 = vadd.f32 %v1069_v32, %v1068_v58 }
 0x1df   : > { %v1075_v19 = vadd.f32 %v1073_v36, %v1063_v15  ;;  %v1076_v40 = vadd.f32 %v1073_v36, %v1070_v28 }
 0x1e1   : > { %v1079_v22 = vcombine.low %v1075_v19, %v1076_v40 }
 0x1e3   : > { %v1086_v14 = vrot.slane %v1079_v22, %v1085_v33 }
 0x1e5   : > { %v1093_v0 = vrot.slane %v1086_v14, %v1085_v33 }
 0x1e7   : > { %1099 = vst.msk [vmem:[%s309_s15] sm:$0x3] %vm1097_vm9, %v1093_v0 }
 0x1e8 PF: > { %p12_p9 = scmp.ge.s32.totalorder %s1410_s22, 4   ;;  %s2108_s18 = smov %s1328_s19 }
 0x1e9   : > { %s2109_s19 = smov %s1419_s25  ;;  %s2110_s20 = smov %s1410_s22 }
 0x1ea   :  { %14 = sbr.rel (!%p12_p9) target bundleno = 2 (0x2), region = 107 }

</bundles_post_ra>
